<compile_context>
chip_gen: v5e
topology: v5e:2x2
jax: 0.10.0
libtpu: 0.0.40
codegen_flags: <defaults>
</compile_context>

<pallas_src>
import jax
import jax.numpy as jnp
from jax.experimental import pallas as pl
from jax.experimental.pallas import tpu as pltpu

Z_DIM = 128      # z_dim
FEAT = 512       # flattened feature size (c * h)
BN_EPS = 1e-5


def _bn_train(v, gamma, beta):
    """BatchNorm1d forward in training mode: per-batch mean / biased variance."""
    mean = jnp.mean(v, axis=0, keepdims=True)
    centered = v - mean
    var = jnp.mean(centered * centered, axis=0, keepdims=True)
    return centered * jax.lax.rsqrt(var + BN_EPS) * gamma + beta


def vae_eval_kernel(k_ref,              # SMEM (N,) f32   mixing scalars (prefetch)
                    x_ref, y_ref,       # VMEM (b, 512) f32   per-request inputs
                    we_ref, be_ref,     # encode:  (512, 2z) bf16, (1, 2z) f32
                    gz_ref, bz_ref,     # bn(z_dim): (1, z), (1, z) f32
                    wd1_ref, bd1_ref,   # decode L1: (z, 512) bf16, (1, 512) f32
                    gd_ref, bd_ref,     # decode BN: (1, 512), (1, 512) f32
                    wd2_ref, bd2_ref,   # decode L2: (512, 512) bf16, (1, 512) f32
                    out_ref):           # VMEM (b, 512) f32
    i = pl.program_id(0)
    k = k_ref[i]
    b = x_ref.shape[0]

    # ---- fused encoder: one MXU pass over [x ; y] stacked on the batch axis ----
    xy = jnp.concatenate([x_ref[...], y_ref[...]], axis=0).astype(jnp.bfloat16)
    enc = jnp.dot(xy, we_ref[...], preferred_element_type=jnp.float32) + be_ref[...]
    enc_x = enc[:b]
    enc_y = enc[b:]

    # chunk(2, dim=1)
    x_mu, x_logvar = enc_x[:, :Z_DIM], enc_x[:, Z_DIM:]
    y_mu, y_logvar = enc_y[:, :Z_DIM], enc_y[:, Z_DIM:]

    # ---- reparameterize (two separate train-mode BN calls, exactly as the module) ----
    gz = gz_ref[...]
    bz = bz_ref[...]
    x_mu_n = _bn_train(x_mu, gz, bz)
    y_mu_n = _bn_train(y_mu, gz, bz)

    mu = (1.0 - k) * x_mu_n + k * y_mu_n
    x_var = jnp.exp(2.0 * x_logvar)        # (exp(logvar)) ** 2
    y_var = jnp.exp(2.0 * y_logvar)
    std = jnp.sqrt((1.0 - k) * x_var + k * y_var)
    z_q = mu + std                         # deterministic, as written in the module

    # ---- decode: Linear(z,512) -> BatchNorm1d(512) -> ReLU -> Linear(512,512) ----
    h = jnp.dot(z_q.astype(jnp.bfloat16), wd1_ref[...],
                preferred_element_type=jnp.float32) + bd1_ref[...]
    h = _bn_train(h, gd_ref[...], bd_ref[...])
    h = jnp.maximum(h, 0.0)
    out = jnp.dot(h.astype(jnp.bfloat16), wd2_ref[...],
                  preferred_element_type=jnp.float32) + bd2_ref[...]

    out_ref[...] = out


def make_params(key, z_dim=Z_DIM, feat=FEAT):
    ks = jax.random.split(key, 6)
    s = 0.02
    bf16 = jnp.bfloat16
    # Matmul weights pre-transposed to (in, out) and stored bf16 (MXU inputs).
    # TODO(synk): optional further win -- int8 weights + per-channel scales on
    # v5e/v6e (fp8 on v7x) would halve weight HBM bytes again.
    return {
        "we":  (s * jax.random.normal(ks[0], (feat, 2 * z_dim), jnp.float32)).astype(bf16),
        "be":  s * jax.random.normal(ks[1], (1, 2 * z_dim), jnp.float32),
        "gz":  jnp.ones((1, z_dim), jnp.float32),
        "bz":  jnp.zeros((1, z_dim), jnp.float32),
        "wd1": (s * jax.random.normal(ks[2], (z_dim, feat), jnp.float32)).astype(bf16),
        "bd1": s * jax.random.normal(ks[3], (1, feat), jnp.float32),
        "gd":  jnp.ones((1, feat), jnp.float32),
        "bd":  jnp.zeros((1, feat), jnp.float32),
        "wd2": (s * jax.random.normal(ks[4], (feat, feat), jnp.float32)).astype(bf16),
        "bd2": s * jax.random.normal(ks[5], (1, feat), jnp.float32),
    }


def _cost_estimate(n_req, b):
    flops = 2 * n_req * (2 * b * FEAT * (2 * Z_DIM)   # fused encoder
                         + b * Z_DIM * FEAT           # decode L1
                         + b * FEAT * FEAT)           # decode L2
    transcendentals = n_req * (2 * b * Z_DIM + 2 * Z_DIM + FEAT)
    weight_bytes = 2 * (FEAT * 2 * Z_DIM + Z_DIM * FEAT + FEAT * FEAT)   # bf16, resident
    param_bytes = 4 * (4 * Z_DIM + 4 * FEAT)                             # biases / BN params
    act_bytes = n_req * (2 * b * FEAT * 4 + b * FEAT * 4)                # f32 in/out per step
    return pl.CostEstimate(flops=flops, transcendentals=transcendentals,
                           bytes_accessed=weight_bytes + param_bytes + act_bytes)


@jax.jit
def vae_eval_forward_many(ks, xs, ys, params):
    """Batched evaluation of N independent (k, x, y) requests.

    ks: (N,) f32; xs, ys: (N, b, c, h) with c*h == 512.
    Weights are DMA'd once and stay VMEM-resident across the request grid."""
    n_req, b, c, h = xs.shape
    assert c * h == FEAT
    x2 = xs.reshape(n_req, b, c * h)        # reshape only: no HBM round-trip
    y2 = ys.reshape(n_req, b, c * h)
    ks = ks.astype(jnp.float32)

    per_req = lambda i, kref: (i, 0, 0)     # activation blocks: one request per step
    resident = lambda i, kref: (0, 0)       # weights/params: constant block -> fetched once

    grid_spec = pltpu.PrefetchScalarGridSpec(
        num_scalar_prefetch=1,              # ks -> SMEM, indexed by program_id in-kernel
        grid=(n_req,),
        in_specs=[
            pl.BlockSpec((None, b, FEAT), per_req),              # x
            pl.BlockSpec((None, b, FEAT), per_req),              # y
            pl.BlockSpec((FEAT, 2 * Z_DIM), resident),           # we
            pl.BlockSpec((1, 2 * Z_DIM), resident),              # be
            pl.BlockSpec((1, Z_DIM), resident),                  # gz
            pl.BlockSpec((1, Z_DIM), resident),                  # bz
            pl.BlockSpec((Z_DIM, FEAT), resident),               # wd1
            pl.BlockSpec((1, FEAT), resident),                   # bd1
            pl.BlockSpec((1, FEAT), resident),                   # gd
            pl.BlockSpec((1, FEAT), resident),                   # bd
            pl.BlockSpec((FEAT, FEAT), resident),                # wd2
            pl.BlockSpec((1, FEAT), resident),                   # bd2
        ],
        out_specs=pl.BlockSpec((None, b, FEAT), per_req),
    )

    out = pl.pallas_call(
        vae_eval_kernel,
        out_shape=jax.ShapeDtypeStruct((n_req, b, FEAT), jnp.float32),
        grid_spec=grid_spec,
        compiler_params=pltpu.CompilerParams(
            dimension_semantics=("parallel",)),   # shard requests across TCs on v7x
        cost_estimate=_cost_estimate(n_req, b),
    )(ks, x2, y2,
      params["we"], params["be"],
      params["gz"], params["bz"],
      params["wd1"], params["bd1"],
      params["gd"], params["bd"],
      params["wd2"], params["bd2"])

    return out.reshape(n_req, b, c, h)


def vae_eval_forward(k, x, y, params):
    """Single-request forward matching the PyTorch module signature."""
    ks = jnp.asarray(k, jnp.float32).reshape((1,))
    out = vae_eval_forward_many(ks, x[None], y[None], params)
    return out[0]


if __name__ == "__main__":
    key = jax.random.PRNGKey(0)
    kp, kx, ky = jax.random.split(key, 3)

    b, c, h = 2, 4, 128          # c * h = 512, matching Linear(512, 2*z_dim)
    params = make_params(kp)
    x = jax.random.normal(kx, (b, c, h), jnp.float32)
    y = jax.random.normal(ky, (b, c, h), jnp.float32)
    k = 0.3

    # single request (module-equivalent call)
    out = jax.block_until_ready(vae_eval_forward(k, x, y, params))
    assert out.shape == (b, c, h)
    assert bool(jnp.all(jnp.isfinite(out)))

    # batched-request grid path (weights VMEM-resident across the grid)
    n_req = 4
    ks = jnp.linspace(0.1, 0.9, n_req, dtype=jnp.float32)
    xs = jax.random.normal(kx, (n_req, b, c, h), jnp.float32)
    ys = jax.random.normal(ky, (n_req, b, c, h), jnp.float32)
    outs = jax.block_until_ready(vae_eval_forward_many(ks, xs, ys, params))
    assert outs.shape == (n_req, b, c, h)
    assert bool(jnp.all(jnp.isfinite(outs)))

    print("KERNEL_OK")
</pallas_src>

<mosaic_0001>
module attributes {stable_mosaic.version = 11 : i64} {
  func.func @vae_eval_kernel(%arg0: i32, %arg1: memref<1xf32, #tpu.memory_space<smem>>, %arg2: memref<1x2x512xf32, #tpu.memory_space<vmem>>, %arg3: memref<1x2x512xf32, #tpu.memory_space<vmem>>, %arg4: memref<512x256xbf16, #tpu.memory_space<vmem>>, %arg5: memref<1x256xf32, #tpu.memory_space<vmem>>, %arg6: memref<1x128xf32, #tpu.memory_space<vmem>>, %arg7: memref<1x128xf32, #tpu.memory_space<vmem>>, %arg8: memref<128x512xbf16, #tpu.memory_space<vmem>>, %arg9: memref<1x512xf32, #tpu.memory_space<vmem>>, %arg10: memref<1x512xf32, #tpu.memory_space<vmem>>, %arg11: memref<1x512xf32, #tpu.memory_space<vmem>>, %arg12: memref<512x512xbf16, #tpu.memory_space<vmem>>, %arg13: memref<1x512xf32, #tpu.memory_space<vmem>>, %arg14: memref<1x2x512xf32, #tpu.memory_space<vmem>>) attributes {dimension_semantics = [#tpu.dimension_semantics<parallel>], iteration_bounds = array<i64: 1>, scalar_prefetch = 1 : i64, scratch_operands = 0 : i64, tpu.core_type = #tpu.core_type<tc>, window_params = [{transform_indices = @transform_0, window_bounds = array<i64: 1, 2, 512>}, {transform_indices = @transform_1, window_bounds = array<i64: 1, 2, 512>}, {pipeline_mode = #tpu.pipeline_mode<synchronous>, transform_indices = @transform_2, window_bounds = array<i64: 512, 256>}, {pipeline_mode = #tpu.pipeline_mode<synchronous>, transform_indices = @transform_3, window_bounds = array<i64: 1, 256>}, {pipeline_mode = #tpu.pipeline_mode<synchronous>, transform_indices = @transform_4, window_bounds = array<i64: 1, 128>}, {pipeline_mode = #tpu.pipeline_mode<synchronous>, transform_indices = @transform_5, window_bounds = array<i64: 1, 128>}, {pipeline_mode = #tpu.pipeline_mode<synchronous>, transform_indices = @transform_6, window_bounds = array<i64: 128, 512>}, {pipeline_mode = #tpu.pipeline_mode<synchronous>, transform_indices = @transform_7, window_bounds = array<i64: 1, 512>}, {pipeline_mode = #tpu.pipeline_mode<synchronous>, transform_indices = @transform_8, window_bounds = array<i64: 1, 512>}, {pipeline_mode = #tpu.pipeline_mode<synchronous>, transform_indices = @transform_9, window_bounds = array<i64: 1, 512>}, {pipeline_mode = #tpu.pipeline_mode<synchronous>, transform_indices = @transform_10, window_bounds = array<i64: 512, 512>}, {pipeline_mode = #tpu.pipeline_mode<synchronous>, transform_indices = @transform_11, window_bounds = array<i64: 1, 512>}, {transform_indices = @transform_12, window_bounds = array<i64: 1, 2, 512>}]} {
    %0 = arith.index_cast %arg0 : i32 to index
    %1 = memref.load %arg1[%0] : memref<1xf32, #tpu.memory_space<smem>>
    %c0 = arith.constant 0 : index
    %c0_0 = arith.constant 0 : index
    %c0_1 = arith.constant 0 : index
    %2 = vector.load %arg2[%c0, %c0_0, %c0_1] : memref<1x2x512xf32, #tpu.memory_space<vmem>>, vector<1x2x512xf32>
    %3 = vector.shape_cast %2 : vector<1x2x512xf32> to vector<2x512xf32>
    %c0_2 = arith.constant 0 : index
    %c0_3 = arith.constant 0 : index
    %c0_4 = arith.constant 0 : index
    %4 = vector.load %arg3[%c0_2, %c0_3, %c0_4] : memref<1x2x512xf32, #tpu.memory_space<vmem>>, vector<1x2x512xf32>
    %5 = vector.shape_cast %4 : vector<1x2x512xf32> to vector<2x512xf32>
    %6 = tpu.concatenate %3, %5 in 0 : vector<2x512xf32>, vector<2x512xf32> -> vector<4x512xf32>
    %7 = arith.truncf %6 : vector<4x512xf32> to vector<4x512xbf16>
    %c0_5 = arith.constant 0 : index
    %c0_6 = arith.constant 0 : index
    %8 = vector.load %arg4[%c0_5, %c0_6] : memref<512x256xbf16, #tpu.memory_space<vmem>>, vector<512x256xbf16>
    %cst = arith.constant dense<0.000000e+00> : vector<4x256xf32>
    %9 = tpu.matmul %7, %8, %cst {dimension_numbers = #tpu.dot_dimension_numbers<[1], [0], [0], [1], [0, 0, 1, 1], [], []>} : vector<4x512xbf16>, vector<512x256xbf16>, vector<4x256xf32> -> vector<4x256xf32>
    %c0_7 = arith.constant 0 : index
    %c0_8 = arith.constant 0 : index
    %10 = vector.load %arg5[%c0_7, %c0_8] : memref<1x256xf32, #tpu.memory_space<vmem>>, vector<1x256xf32>
    %11 = vector.broadcast %10 : vector<1x256xf32> to vector<4x256xf32>
    %12 = arith.addf %9, %11 : vector<4x256xf32>
    %13 = vector.extract_strided_slice %12 {offsets = [0, 0], sizes = [2, 256], strides = [1, 1]} : vector<4x256xf32> to vector<2x256xf32>
    %14 = vector.extract_strided_slice %12 {offsets = [2, 0], sizes = [2, 256], strides = [1, 1]} : vector<4x256xf32> to vector<2x256xf32>
    %15 = vector.extract_strided_slice %13 {offsets = [0, 0], sizes = [2, 128], strides = [1, 1]} : vector<2x256xf32> to vector<2x128xf32>
    %16 = vector.extract_strided_slice %13 {offsets = [0, 128], sizes = [2, 128], strides = [1, 1]} : vector<2x256xf32> to vector<2x128xf32>
    %17 = vector.extract_strided_slice %14 {offsets = [0, 0], sizes = [2, 128], strides = [1, 1]} : vector<2x256xf32> to vector<2x128xf32>
    %18 = vector.extract_strided_slice %14 {offsets = [0, 128], sizes = [2, 128], strides = [1, 1]} : vector<2x256xf32> to vector<2x128xf32>
    %c0_9 = arith.constant 0 : index
    %c0_10 = arith.constant 0 : index
    %19 = vector.load %arg6[%c0_9, %c0_10] : memref<1x128xf32, #tpu.memory_space<vmem>>, vector<1x128xf32>
    %c0_11 = arith.constant 0 : index
    %c0_12 = arith.constant 0 : index
    %20 = vector.load %arg7[%c0_11, %c0_12] : memref<1x128xf32, #tpu.memory_space<vmem>>, vector<1x128xf32>
    %cst_13 = arith.constant dense<0.000000e+00> : vector<128xf32>
    %21 = vector.multi_reduction <add>, %15, %cst_13 [0] : vector<2x128xf32> to vector<128xf32>
    %22 = vector.shape_cast %21 : vector<128xf32> to vector<1x128xf32>
    %cst_14 = arith.constant 2.000000e+00 : f32
    %23 = vector.broadcast %cst_14 : f32 to vector<1x128xf32>
    %24 = arith.divf %22, %23 : vector<1x128xf32>
    %25 = vector.broadcast %24 : vector<1x128xf32> to vector<2x128xf32>
    %26 = arith.subf %15, %25 : vector<2x128xf32>
    %27 = arith.mulf %26, %26 : vector<2x128xf32>
    %cst_15 = arith.constant dense<0.000000e+00> : vector<128xf32>
    %28 = vector.multi_reduction <add>, %27, %cst_15 [0] : vector<2x128xf32> to vector<128xf32>
    %29 = vector.shape_cast %28 : vector<128xf32> to vector<1x128xf32>
    %cst_16 = arith.constant 2.000000e+00 : f32
    %30 = vector.broadcast %cst_16 : f32 to vector<1x128xf32>
    %31 = arith.divf %29, %30 : vector<1x128xf32>
    %cst_17 = arith.constant 9.99999974E-6 : f32
    %32 = vector.broadcast %cst_17 : f32 to vector<1x128xf32>
    %33 = arith.addf %31, %32 : vector<1x128xf32>
    %34 = math.rsqrt %33 : vector<1x128xf32>
    %35 = vector.broadcast %34 : vector<1x128xf32> to vector<2x128xf32>
    %36 = arith.mulf %26, %35 : vector<2x128xf32>
    %37 = vector.broadcast %19 : vector<1x128xf32> to vector<2x128xf32>
    %38 = arith.mulf %36, %37 : vector<2x128xf32>
    %39 = vector.broadcast %20 : vector<1x128xf32> to vector<2x128xf32>
    %40 = arith.addf %38, %39 : vector<2x128xf32>
    %cst_18 = arith.constant dense<0.000000e+00> : vector<128xf32>
    %41 = vector.multi_reduction <add>, %17, %cst_18 [0] : vector<2x128xf32> to vector<128xf32>
    %42 = vector.shape_cast %41 : vector<128xf32> to vector<1x128xf32>
    %cst_19 = arith.constant 2.000000e+00 : f32
    %43 = vector.broadcast %cst_19 : f32 to vector<1x128xf32>
    %44 = arith.divf %42, %43 : vector<1x128xf32>
    %45 = vector.broadcast %44 : vector<1x128xf32> to vector<2x128xf32>
    %46 = arith.subf %17, %45 : vector<2x128xf32>
    %47 = arith.mulf %46, %46 : vector<2x128xf32>
    %cst_20 = arith.constant dense<0.000000e+00> : vector<128xf32>
    %48 = vector.multi_reduction <add>, %47, %cst_20 [0] : vector<2x128xf32> to vector<128xf32>
    %49 = vector.shape_cast %48 : vector<128xf32> to vector<1x128xf32>
    %cst_21 = arith.constant 2.000000e+00 : f32
    %50 = vector.broadcast %cst_21 : f32 to vector<1x128xf32>
    %51 = arith.divf %49, %50 : vector<1x128xf32>
    %cst_22 = arith.constant 9.99999974E-6 : f32
    %52 = vector.broadcast %cst_22 : f32 to vector<1x128xf32>
    %53 = arith.addf %51, %52 : vector<1x128xf32>
    %54 = math.rsqrt %53 : vector<1x128xf32>
    %55 = vector.broadcast %54 : vector<1x128xf32> to vector<2x128xf32>
    %56 = arith.mulf %46, %55 : vector<2x128xf32>
    %57 = vector.broadcast %19 : vector<1x128xf32> to vector<2x128xf32>
    %58 = arith.mulf %56, %57 : vector<2x128xf32>
    %59 = vector.broadcast %20 : vector<1x128xf32> to vector<2x128xf32>
    %60 = arith.addf %58, %59 : vector<2x128xf32>
    %cst_23 = arith.constant 1.000000e+00 : f32
    %61 = arith.subf %cst_23, %1 : f32
    %62 = vector.broadcast %61 : f32 to vector<2x128xf32>
    %63 = arith.mulf %62, %40 : vector<2x128xf32>
    %64 = vector.broadcast %1 : f32 to vector<2x128xf32>
    %65 = arith.mulf %64, %60 : vector<2x128xf32>
    %66 = arith.addf %63, %65 : vector<2x128xf32>
    %cst_24 = arith.constant 2.000000e+00 : f32
    %67 = vector.broadcast %cst_24 : f32 to vector<2x128xf32>
    %68 = arith.mulf %67, %16 : vector<2x128xf32>
    %69 = math.exp %68 : vector<2x128xf32>
    %cst_25 = arith.constant 2.000000e+00 : f32
    %70 = vector.broadcast %cst_25 : f32 to vector<2x128xf32>
    %71 = arith.mulf %70, %18 : vector<2x128xf32>
    %72 = math.exp %71 : vector<2x128xf32>
    %cst_26 = arith.constant 1.000000e+00 : f32
    %73 = arith.subf %cst_26, %1 : f32
    %74 = vector.broadcast %73 : f32 to vector<2x128xf32>
    %75 = arith.mulf %74, %69 : vector<2x128xf32>
    %76 = vector.broadcast %1 : f32 to vector<2x128xf32>
    %77 = arith.mulf %76, %72 : vector<2x128xf32>
    %78 = arith.addf %75, %77 : vector<2x128xf32>
    %79 = math.sqrt %78 : vector<2x128xf32>
    %80 = arith.addf %66, %79 : vector<2x128xf32>
    %81 = arith.truncf %80 : vector<2x128xf32> to vector<2x128xbf16>
    %c0_27 = arith.constant 0 : index
    %c0_28 = arith.constant 0 : index
    %82 = vector.load %arg8[%c0_27, %c0_28] : memref<128x512xbf16, #tpu.memory_space<vmem>>, vector<128x512xbf16>
    %cst_29 = arith.constant dense<0.000000e+00> : vector<2x512xf32>
    %83 = tpu.matmul %81, %82, %cst_29 {dimension_numbers = #tpu.dot_dimension_numbers<[1], [0], [0], [1], [0, 0, 1, 1], [], []>} : vector<2x128xbf16>, vector<128x512xbf16>, vector<2x512xf32> -> vector<2x512xf32>
    %c0_30 = arith.constant 0 : index
    %c0_31 = arith.constant 0 : index
    %84 = vector.load %arg9[%c0_30, %c0_31] : memref<1x512xf32, #tpu.memory_space<vmem>>, vector<1x512xf32>
    %85 = vector.broadcast %84 : vector<1x512xf32> to vector<2x512xf32>
    %86 = arith.addf %83, %85 : vector<2x512xf32>
    %c0_32 = arith.constant 0 : index
    %c0_33 = arith.constant 0 : index
    %87 = vector.load %arg10[%c0_32, %c0_33] : memref<1x512xf32, #tpu.memory_space<vmem>>, vector<1x512xf32>
    %c0_34 = arith.constant 0 : index
    %c0_35 = arith.constant 0 : index
    %88 = vector.load %arg11[%c0_34, %c0_35] : memref<1x512xf32, #tpu.memory_space<vmem>>, vector<1x512xf32>
    %cst_36 = arith.constant dense<0.000000e+00> : vector<512xf32>
    %89 = vector.multi_reduction <add>, %86, %cst_36 [0] : vector<2x512xf32> to vector<512xf32>
    %90 = vector.shape_cast %89 : vector<512xf32> to vector<1x512xf32>
    %cst_37 = arith.constant 2.000000e+00 : f32
    %91 = vector.broadcast %cst_37 : f32 to vector<1x512xf32>
    %92 = arith.divf %90, %91 : vector<1x512xf32>
    %93 = vector.broadcast %92 : vector<1x512xf32> to vector<2x512xf32>
    %94 = arith.subf %86, %93 : vector<2x512xf32>
    %95 = arith.mulf %94, %94 : vector<2x512xf32>
    %cst_38 = arith.constant dense<0.000000e+00> : vector<512xf32>
    %96 = vector.multi_reduction <add>, %95, %cst_38 [0] : vector<2x512xf32> to vector<512xf32>
    %97 = vector.shape_cast %96 : vector<512xf32> to vector<1x512xf32>
    %cst_39 = arith.constant 2.000000e+00 : f32
    %98 = vector.broadcast %cst_39 : f32 to vector<1x512xf32>
    %99 = arith.divf %97, %98 : vector<1x512xf32>
    %cst_40 = arith.constant 9.99999974E-6 : f32
    %100 = vector.broadcast %cst_40 : f32 to vector<1x512xf32>
    %101 = arith.addf %99, %100 : vector<1x512xf32>
    %102 = math.rsqrt %101 : vector<1x512xf32>
    %103 = vector.broadcast %102 : vector<1x512xf32> to vector<2x512xf32>
    %104 = arith.mulf %94, %103 : vector<2x512xf32>
    %105 = vector.broadcast %87 : vector<1x512xf32> to vector<2x512xf32>
    %106 = arith.mulf %104, %105 : vector<2x512xf32>
    %107 = vector.broadcast %88 : vector<1x512xf32> to vector<2x512xf32>
    %108 = arith.addf %106, %107 : vector<2x512xf32>
    %cst_41 = arith.constant 0.000000e+00 : f32
    %109 = vector.broadcast %cst_41 : f32 to vector<2x512xf32>
    %110 = arith.maximumf %108, %109 : vector<2x512xf32>
    %111 = arith.truncf %110 : vector<2x512xf32> to vector<2x512xbf16>
    %c0_42 = arith.constant 0 : index
    %c0_43 = arith.constant 0 : index
    %112 = vector.load %arg12[%c0_42, %c0_43] : memref<512x512xbf16, #tpu.memory_space<vmem>>, vector<512x512xbf16>
    %cst_44 = arith.constant dense<0.000000e+00> : vector<2x512xf32>
    %113 = tpu.matmul %111, %112, %cst_44 {dimension_numbers = #tpu.dot_dimension_numbers<[1], [0], [0], [1], [0, 0, 1, 1], [], []>} : vector<2x512xbf16>, vector<512x512xbf16>, vector<2x512xf32> -> vector<2x512xf32>
    %c0_45 = arith.constant 0 : index
    %c0_46 = arith.constant 0 : index
    %114 = vector.load %arg13[%c0_45, %c0_46] : memref<1x512xf32, #tpu.memory_space<vmem>>, vector<1x512xf32>
    %115 = vector.broadcast %114 : vector<1x512xf32> to vector<2x512xf32>
    %116 = arith.addf %113, %115 : vector<2x512xf32>
    %c0_47 = arith.constant 0 : index
    %c0_48 = arith.constant 0 : index
    %c0_49 = arith.constant 0 : index
    %117 = vector.load %arg14[%c0_47, %c0_48, %c0_49] : memref<1x2x512xf32, #tpu.memory_space<vmem>>, vector<1x2x512xf32>
    %118 = vector.shape_cast %117 : vector<1x2x512xf32> to vector<2x512xf32>
    %119 = vector.shape_cast %116 : vector<2x512xf32> to vector<1x2x512xf32>
    tpu.vector_store %arg14[%c0_47, %c0_48, %c0_49], %119 {strides = array<i32>} : memref<1x2x512xf32, #tpu.memory_space<vmem>>, vector<1x2x512xf32>,
    return
  }
  func.func @transform_0(%arg0: i32, %arg1: memref<1xf32, #tpu.memory_space<smem>>) -> (i32, i32, i32) {
    %c0_i32 = arith.constant 0 : i32
    %c0_i32_0 = arith.constant 0 : i32
    %c0_i32_1 = arith.constant 0 : i32
    return %arg0, %c0_i32, %c0_i32_0 : i32, i32, i32
  }
  func.func @transform_1(%arg0: i32, %arg1: memref<1xf32, #tpu.memory_space<smem>>) -> (i32, i32, i32) {
    %c0_i32 = arith.constant 0 : i32
    %c0_i32_0 = arith.constant 0 : i32
    %c0_i32_1 = arith.constant 0 : i32
    return %arg0, %c0_i32, %c0_i32_0 : i32, i32, i32
  }
  func.func @transform_2(%arg0: i32, %arg1: memref<1xf32, #tpu.memory_space<smem>>) -> (i32, i32) {
    %c0_i32 = arith.constant 0 : i32
    %c0_i32_0 = arith.constant 0 : i32
    %c0_i32_1 = arith.constant 0 : i32
    return %c0_i32, %c0_i32_0 : i32, i32
  }
  func.func @transform_3(%arg0: i32, %arg1: memref<1xf32, #tpu.memory_space<smem>>) -> (i32, i32) {
    %c0_i32 = arith.constant 0 : i32
    %c0_i32_0 = arith.constant 0 : i32
    %c0_i32_1 = arith.constant 0 : i32
    return %c0_i32, %c0_i32_0 : i32, i32
  }
  func.func @transform_4(%arg0: i32, %arg1: memref<1xf32, #tpu.memory_space<smem>>) -> (i32, i32) {
    %c0_i32 = arith.constant 0 : i32
    %c0_i32_0 = arith.constant 0 : i32
    %c0_i32_1 = arith.constant 0 : i32
    return %c0_i32, %c0_i32_0 : i32, i32
  }
  func.func @transform_5(%arg0: i32, %arg1: memref<1xf32, #tpu.memory_space<smem>>) -> (i32, i32) {
    %c0_i32 = arith.constant 0 : i32
    %c0_i32_0 = arith.constant 0 : i32
    %c0_i32_1 = arith.constant 0 : i32
    return %c0_i32, %c0_i32_0 : i32, i32
  }
  func.func @transform_6(%arg0: i32, %arg1: memref<1xf32, #tpu.memory_space<smem>>) -> (i32, i32) {
    %c0_i32 = arith.constant 0 : i32
    %c0_i32_0 = arith.constant 0 : i32
    %c0_i32_1 = arith.constant 0 : i32
    return %c0_i32, %c0_i32_0 : i32, i32
  }
  func.func @transform_7(%arg0: i32, %arg1: memref<1xf32, #tpu.memory_space<smem>>) -> (i32, i32) {
    %c0_i32 = arith.constant 0 : i32
    %c0_i32_0 = arith.constant 0 : i32
    %c0_i32_1 = arith.constant 0 : i32
    return %c0_i32, %c0_i32_0 : i32, i32
  }
  func.func @transform_8(%arg0: i32, %arg1: memref<1xf32, #tpu.memory_space<smem>>) -> (i32, i32) {
    %c0_i32 = arith.constant 0 : i32
    %c0_i32_0 = arith.constant 0 : i32
    %c0_i32_1 = arith.constant 0 : i32
    return %c0_i32, %c0_i32_0 : i32, i32
  }
  func.func @transform_9(%arg0: i32, %arg1: memref<1xf32, #tpu.memory_space<smem>>) -> (i32, i32) {
    %c0_i32 = arith.constant 0 : i32
    %c0_i32_0 = arith.constant 0 : i32
    %c0_i32_1 = arith.constant 0 : i32
    return %c0_i32, %c0_i32_0 : i32, i32
  }
  func.func @transform_10(%arg0: i32, %arg1: memref<1xf32, #tpu.memory_space<smem>>) -> (i32, i32) {
    %c0_i32 = arith.constant 0 : i32
    %c0_i32_0 = arith.constant 0 : i32
    %c0_i32_1 = arith.constant 0 : i32
    return %c0_i32, %c0_i32_0 : i32, i32
  }
  func.func @transform_11(%arg0: i32, %arg1: memref<1xf32, #tpu.memory_space<smem>>) -> (i32, i32) {
    %c0_i32 = arith.constant 0 : i32
    %c0_i32_0 = arith.constant 0 : i32
    %c0_i32_1 = arith.constant 0 : i32
    return %c0_i32, %c0_i32_0 : i32, i32
  }
  func.func @transform_12(%arg0: i32, %arg1: memref<1xf32, #tpu.memory_space<smem>>) -> (i32, i32, i32) {
    %c0_i32 = arith.constant 0 : i32
    %c0_i32_0 = arith.constant 0 : i32
    %c0_i32_1 = arith.constant 0 : i32
    return %arg0, %c0_i32, %c0_i32_0 : i32, i32, i32
  }
}

</mosaic_0001>

<bundles_post_ra>
// kernel: vae_eval_forward_many.1
= control target key start
LH: loop header
LB: loop body
LE: loop exit
PB: predicated region body
PF: predicated region fallthrough
CT: control target
= control target key end

     0   :  { %19 = vsyncpa [#allocation5], 0  ;;  %s3659_s0 = inlined_call_operand.<no memory space> [shape: f32[1], index: 0, kind: input, shape index: {}]   ;;  %s3660_s1 = inlined_call_operand.vmem [shape: f32[1,2,512], index: 1, kind: input, shape index: {}]   ;;  %s3661_s2 = inlined_call_operand.vmem [shape: f32[1,2,512], index: 2, kind: input, shape index: {}]   ;;  %s3662_s3 = inlined_call_operand.hbm [shape: bf16[512,256], index: 3, kind: input, shape index: {}]   ;;  %s3663_s4 = inlined_call_operand.vmem [shape: f32[1,256], index: 4, kind: input, shape index: {}]   ;;  %s3664_s5 = inlined_call_operand.vmem [shape: f32[1,128], index: 5, kind: input, shape index: {}]   ;;  %s3665_s6 = inlined_call_operand.vmem [shape: f32[1,128], index: 6, kind: input, shape index: {}]   ;;  %s3666_s7 = inlined_call_operand.hbm [shape: bf16[128,512], index: 7, kind: input, shape index: {}]   ;;  %s3667_s8 = inlined_call_operand.vmem [shape: f32[1,512], index: 8, kind: input, shape index: {}]   ;;  %s3668_s9 = inlined_call_operand.vmem [shape: f32[1,512], index: 9, kind: input, shape index: {}]   ;;  %s3669_s10 = inlined_call_operand.vmem [shape: f32[1,512], index: 10, kind: input, shape index: {}]   ;;  %s3670_s11 = inlined_call_operand.hbm [shape: bf16[512,512], index: 11, kind: input, shape index: {}]   ;;  %s3671_s12 = inlined_call_operand.vmem [shape: f32[1,512], index: 12, kind: input, shape index: {}]   ;;  %s3672_s13 = inlined_call_operand.vmem [shape: f32[1,2,512], index: 13, kind: output, shape index: {}]  }
   0x1   :  { %20 = vsyncpa [#allocation7], 0  ;;  %s48_s27 = sshll.u32 %s3666_s7, 4  ;;  %s3374_s28 = smov [#allocation6]   ;;  %s49_s27 = int_to_ptr.hbm [resolvable:$true] %s48_s27 }
   0x2   :  { %s50_s29 = sshll.u32 %s3374_s28, 4  ;;  %s29_s15 = sshll.u32 %s3662_s3, 4  ;;  %s51_s29 = int_to_ptr.vmem [resolvable:$true] %s50_s29  ;;  %s30_s15 = int_to_ptr.hbm [resolvable:$true] %s29_s15 }
   0x3   :  { %s3375_s16 = smov 256   ;;  %s3376_s17 = smov 16  }
   0x4   :  { %56 = dma.hbm_to_vmem [thread:$0]  %s49_s27, 4096, %s51_s29, [#allocation7], %s3375_s16, %s3375_s16, %s3376_s17  }
   0x5   :  { %s3377_s18 = smov [#allocation4]   ;;  %s3378_s20 = smov 128  }
   0x6   :  { %s31_s19 = sshll.u32 %s3377_s18, 4  ;;  %s3379_s21 = smov 8   ;;  %s32_s19 = int_to_ptr.vmem [resolvable:$true] %s31_s19 }
   0x7   :  { %37 = dma.hbm_to_vmem [thread:$0]  %s30_s15, 8192, %s32_s19, [#allocation5], %s3378_s20, %s3378_s20, %s3379_s21  }
   0x8   :  { %s67_s23 = sshll.u32 %s3670_s11, 4  ;;  %s3380_s24 = smov [#allocation8]   ;;  %s68_s23 = int_to_ptr.hbm [resolvable:$true] %s67_s23 }
   0x9   :  { %s69_s25 = sshll.u32 %s3380_s24, 4  ;;  %s70_s25 = int_to_ptr.vmem [resolvable:$true] %s69_s25 }
   0xa   :  { %75 = dma.hbm_to_vmem [thread:$0]  %s68_s23, 16384, %s70_s25, [#allocation7], %s3375_s16, %s3375_s16, %s3376_s17  }
   0xb   :  { %3370 = dma.done.wait [#allocation5], 8192  }
   0xc   :  { %3371 = vsyncadd [#allocation5], 4294959104 }
   0xd   :  { %3372 = dma.done.wait [#allocation7], 20480  }
   0xe   :  { %3373 = vsyncadd [#allocation7], 4294946816  ;;  %v2208_v0 = vld [vmem:[#allocation4 + $0x70] sm:$0xf]  ;;  %v3061_v1 = vld [vmem:[#allocation4 + $0x74] sm:$0xf0] }
   0xf   :  { %v2272_v2 = vld [vmem:[#allocation4 + $0xf0] sm:$0xf]  ;;  %v2209_v3 = vor.u32 %v3061_v1, %v2208_v0  ;;  %v3077_v4 = vld [vmem:[#allocation4 + $0xf4] sm:$0xf0]  ;;  %v2200_v11 = vld [vmem:[#allocation4 + $0x60] sm:$0xf] }
  0x10   :  { %v2336_v5 = vld [vmem:[#allocation4 + $0x170] sm:$0xf]  ;;  %v3093_v6 = vld [vmem:[#allocation4 + $0x174] sm:$0xf0]  ;;  %v2273_v7 = vor.u32 %v3077_v4, %v2272_v2  ;;  %v3059_v13 = vld [vmem:[#allocation4 + $0x64] sm:$0xf0] }
  0x11   :  { %v2337_v8 = vor.u32 %v3093_v6, %v2336_v5  ;;  %v2400_v9 = vld [vmem:[#allocation4 + $0x1f0] sm:$0xf]  ;;  %v3109_v10 = vld [vmem:[#allocation4 + $0x1f4] sm:$0xf0]  ;;  %513 = vmatpush.bf16.msra.mxu0 %v2209_v3  ;;  %v2264_v14 = vld [vmem:[#allocation4 + $0xe0] sm:$0xf]  ;;  %v2201_v16 = vor.u32 %v3059_v13, %v2200_v11 }
  0x12   :  { %v2401_v12 = vor.u32 %v3109_v10, %v2400_v9  ;;  %v3075_v15 = vld [vmem:[#allocation4 + $0xe4] sm:$0xf0]  ;;  %526 = vmatpush.bf16.msra.mxu1 %v2273_v7  ;;  %v2328_v18 = vld [vmem:[#allocation4 + $0x160] sm:$0xf]  ;;  %v2192_v23 = vld [vmem:[#allocation4 + $0x50] sm:$0xf] }
  0x13   :  { %539 = vmatpush.bf16.msra.mxu2 %v2337_v8  ;;  %v2265_v17 = vor.u32 %v3075_v15, %v2264_v14  ;;  %v3091_v19 = vld [vmem:[#allocation4 + $0x164] sm:$0xf0]  ;;  %v2392_v20 = vld [vmem:[#allocation4 + $0x1e0] sm:$0xf]  ;;  %v3057_v24 = vld [vmem:[#allocation4 + $0x54] sm:$0xf0] }
  0x14   :  { %552 = vmatpush.bf16.msra.mxu3 %v2401_v12  ;;  %v2329_v21 = vor.u32 %v3091_v19, %v2328_v18  ;;  %v3107_v22 = vld [vmem:[#allocation4 + $0x1e4] sm:$0xf0]  ;;  %v2256_v26 = vld [vmem:[#allocation4 + $0xd0] sm:$0xf]  ;;  %v3073_v27 = vld [vmem:[#allocation4 + $0xd4] sm:$0xf0]  ;;  %v2193_v29 = vor.u32 %v3057_v24, %v2192_v23 }
  0x15   :  { %v2393_v25 = vor.u32 %v3107_v22, %v2392_v20  ;;  %v2320_v28 = vld [vmem:[#allocation4 + $0x150] sm:$0xf]  ;;  %514 = vmatpush.bf16.msra.mxu0 %v2201_v16  ;;  %v3089_v30 = vld [vmem:[#allocation4 + $0x154] sm:$0xf0]  ;;  %v2257_v33 = vor.u32 %v3073_v27, %v2256_v26  ;;  %v2184_v35 = vld [vmem:[#allocation4 + $0x40] sm:$0xf] }
  0x16   :  { %v2384_v31 = vld [vmem:[#allocation4 + $0x1d0] sm:$0xf]  ;;  %v3105_v32 = vld [vmem:[#allocation4 + $0x1d4] sm:$0xf0]  ;;  %527 = vmatpush.bf16.msra.mxu1 %v2265_v17  ;;  %v2321_v34 = vor.u32 %v3089_v30, %v2320_v28  ;;  %v3055_v36 = vld [vmem:[#allocation4 + $0x44] sm:$0xf0] }
  0x17   :  { %540 = vmatpush.bf16.msra.mxu2 %v2329_v21  ;;  %v2248_v37 = vld [vmem:[#allocation4 + $0xc0] sm:$0xf]  ;;  %v2385_v38 = vor.u32 %v3105_v32, %v2384_v31  ;;  %v3071_v39 = vld [vmem:[#allocation4 + $0xc4] sm:$0xf0]  ;;  %v2185_v44 = vor.u32 %v3055_v36, %v2184_v35  ;;  %v2176_v47 = vld [vmem:[#allocation4 + $0x30] sm:$0xf] }
  0x18   :  { %553 = vmatpush.bf16.msra.mxu3 %v2393_v25  ;;  %v2312_v40 = vld [vmem:[#allocation4 + $0x140] sm:$0xf]  ;;  %v3087_v41 = vld [vmem:[#allocation4 + $0x144] sm:$0xf0]  ;;  %v2249_v45 = vor.u32 %v3071_v39, %v2248_v37  ;;  %v3053_v48 = vld [vmem:[#allocation4 + $0x34] sm:$0xf0] }
  0x19   :  { %v2376_v42 = vld [vmem:[#allocation4 + $0x1c0] sm:$0xf]  ;;  %v3103_v43 = vld [vmem:[#allocation4 + $0x1c4] sm:$0xf0]  ;;  %515 = vmatpush.bf16.msra.mxu0 %v2193_v29  ;;  %v2313_v46 = vor.u32 %v3087_v41, %v2312_v40  ;;  %v2240_v49 = vld [vmem:[#allocation4 + $0xb0] sm:$0xf]  ;;  %v2177_v56 = vor.u32 %v3053_v48, %v2176_v47 }
  0x1a   :  { %528 = vmatpush.bf16.msra.mxu1 %v2257_v33  ;;  %v2377_v50 = vor.u32 %v3103_v43, %v2376_v42  ;;  %v3069_v51 = vld [vmem:[#allocation4 + $0xb4] sm:$0xf0]  ;;  %v2304_v52 = vld [vmem:[#allocation4 + $0x130] sm:$0xf]  ;;  %v2168_v59 = vld [vmem:[#allocation4 + $0x20] sm:$0xf] }
  0x1b   :  { %541 = vmatpush.bf16.msra.mxu2 %v2321_v34  ;;  %v3085_v53 = vld [vmem:[#allocation4 + $0x134] sm:$0xf0]  ;;  %v2368_v54 = vld [vmem:[#allocation4 + $0x1b0] sm:$0xf]  ;;  %v2241_v57 = vor.u32 %v3069_v51, %v2240_v49  ;;  %v3051_v60 = vld [vmem:[#allocation4 + $0x24] sm:$0xf0] }
  0x1c   :  { %554 = vmatpush.bf16.msra.mxu3 %v2385_v38  ;;  %v3101_v55 = vld [vmem:[#allocation4 + $0x1b4] sm:$0xf0]  ;;  %v2305_v58 = vor.u32 %v3085_v53, %v2304_v52  ;;  %v2232_v61 = vld [vmem:[#allocation4 + $0xa0] sm:$0xf]  ;;  %v3067_v63 = vld [vmem:[#allocation4 + $0xa4] sm:$0xf0]  ;;  %v2169_v4 = vor.u32 %v3051_v60, %v2168_v59 }
  0x1d   :  { %516 = vmatpush.bf16.msra.mxu0 %v2185_v44  ;;  %v2369_v62 = vor.u32 %v3101_v55, %v2368_v54  ;;  %v2296_v0 = vld [vmem:[#allocation4 + $0x120] sm:$0xf]  ;;  %v3083_v1 = vld [vmem:[#allocation4 + $0x124] sm:$0xf0]  ;;  %v2233_v5 = vor.u32 %v3067_v63, %v2232_v61  ;;  %v2160_v7 = vld [vmem:[#allocation4 + $0x10] sm:$0xf] }
  0x1e   :  { %529 = vmatpush.bf16.msra.mxu1 %v2249_v45  ;;  %v2360_v2 = vld [vmem:[#allocation4 + $0x1a0] sm:$0xf]  ;;  %v3099_v3 = vld [vmem:[#allocation4 + $0x1a4] sm:$0xf0]  ;;  %v2297_v6 = vor.u32 %v3083_v1, %v2296_v0  ;;  %v3049_v8 = vld [vmem:[#allocation4 + $0x14] sm:$0xf0] }
  0x1f   :  { %542 = vmatpush.bf16.msra.mxu2 %v2313_v46  ;;  %v2224_v9 = vld [vmem:[#allocation4 + $0x90] sm:$0xf]  ;;  %v2361_v10 = vor.u32 %v3099_v3, %v2360_v2  ;;  %v3065_v11 = vld [vmem:[#allocation4 + $0x94] sm:$0xf0]  ;;  %v2152_v16 = vld [vmem:[#allocation4] sm:$0xf]  ;;  %v2161_v17 = vor.u32 %v3049_v8, %v2160_v7 }
  0x20   :  { %555 = vmatpush.bf16.msra.mxu3 %v2377_v50  ;;  %v2288_v12 = vld [vmem:[#allocation4 + $0x110] sm:$0xf]  ;;  %v3081_v13 = vld [vmem:[#allocation4 + $0x114] sm:$0xf0]  ;;  %v3047_v18 = vld [vmem:[#allocation4 + $0x4] sm:$0xf0]  ;;  %v2225_v21 = vor.u32 %v3065_v11, %v2224_v9 }
  0x21   :  { %517 = vmatpush.bf16.msra.mxu0 %v2177_v56  ;;  %v2352_v14 = vld [vmem:[#allocation4 + $0x190] sm:$0xf]  ;;  %v3097_v15 = vld [vmem:[#allocation4 + $0x194] sm:$0xf0]  ;;  %v2216_v19 = vld [vmem:[#allocation4 + $0x80] sm:$0xf]  ;;  %v2289_v22 = vor.u32 %v3081_v13, %v2288_v12  ;;  %v2153_v32 = vor.u32 %v3047_v18, %v2152_v16 }
  0x22   :  { %530 = vmatpush.bf16.msra.mxu1 %v2241_v57  ;;  %v3063_v20 = vld [vmem:[#allocation4 + $0x84] sm:$0xf0]  ;;  %v2280_v23 = vld [vmem:[#allocation4 + $0x100] sm:$0xf]  ;;  %v91_v25 = vld [vmem:[%s3660_s1] sm:$0xff]  ;;  %v2353_v26 = vor.u32 %v3097_v15, %v2352_v14  ;;  %vm114_vm0 = vcmask 1041408  }
  0x23   :  { %543 = vmatpush.bf16.msra.mxu2 %v2305_v58  ;;  %v3079_v24 = vld [vmem:[#allocation4 + $0x104] sm:$0xf0]  ;;  %v2344_v27 = vld [vmem:[#allocation4 + $0x180] sm:$0xf]  ;;  %94 = vst [vmem:[#allocation1] ss:$4 sm:$0xff] %v91_v25  ;;  %v2217_v36 = vor.u32 %v3063_v20, %v2216_v19 }
  0x24   :  { %556 = vmatpush.bf16.msra.mxu3 %v2369_v62  ;;  %v3095_v28 = vld [vmem:[#allocation4 + $0x184] sm:$0xf0]  ;;  %v3060_v29 = vld [vmem:[#allocation4 + $0x74] sm:$0xf]  ;;  %v2210_v30 = vld [vmem:[#allocation4 + $0x78] sm:$0xf0]  ;;  %v2281_v37 = vor.u32 %v3079_v24, %v2280_v23 }
  0x25   :  { %518 = vmatpush.bf16.msra.mxu0 %v2169_v4  ;;  %v3076_v31 = vld [vmem:[#allocation4 + $0xf4] sm:$0xf]  ;;  %v2274_v33 = vld [vmem:[#allocation4 + $0xf8] sm:$0xf0]  ;;  %v2345_v40 = vor.u32 %v3095_v28, %v2344_v27  ;;  %v2213_v41 = vor.u32 %v3060_v29, %v2210_v30  ;;  %v3058_v43 = vld [vmem:[#allocation4 + $0x64] sm:$0xf] }
  0x26   :  { %531 = vmatpush.bf16.msra.mxu1 %v2233_v5  ;;  %v3092_v34 = vld [vmem:[#allocation4 + $0x174] sm:$0xf]  ;;  %v2338_v35 = vld [vmem:[#allocation4 + $0x178] sm:$0xf0]  ;;  %v2202_v44 = vld [vmem:[#allocation4 + $0x68] sm:$0xf0]  ;;  %v2277_v45 = vor.u32 %v3076_v31, %v2274_v33 }
  0x27   :  { %544 = vmatpush.bf16.msra.mxu2 %v2297_v6  ;;  %v3108_v38 = vld [vmem:[#allocation4 + $0x1f4] sm:$0xf]  ;;  %v2402_v39 = vld [vmem:[#allocation4 + $0x1f8] sm:$0xf0]  ;;  %v2341_v46 = vor.u32 %v3092_v34, %v2338_v35  ;;  %v3074_v47 = vld [vmem:[#allocation4 + $0xe4] sm:$0xf]  ;;  %v2205_v59 = vor.u32 %v3058_v43, %v2202_v44 }
  0x28   :  { %557 = vmatpush.bf16.msra.mxu3 %v2361_v10  ;;  %v92_v42 = vld [vmem:[%s3661_s2] sm:$0xff]  ;;  %v2266_v48 = vld [vmem:[#allocation4 + $0xe8] sm:$0xf0]  ;;  %v3090_v49 = vld [vmem:[#allocation4 + $0x164] sm:$0xf]  ;;  %v2405_v50 = vor.u32 %v3108_v38, %v2402_v39  ;;  %s702_s29 = ssub.f32 1.0, %s3659_s0 }
  0x29   :  { %519 = vmatpush.bf16.msra.mxu0 %v2161_v17  ;;  %v2330_v51 = vld [vmem:[#allocation4 + $0x168] sm:$0xf0]  ;;  %v3106_v52 = vld [vmem:[#allocation4 + $0x1e4] sm:$0xf]  ;;  %v3056_v56 = vld [vmem:[#allocation4 + $0x54] sm:$0xf]  ;;  %v2269_v60 = vor.u32 %v3074_v47, %v2266_v48 }
  0x2a   :  { %532 = vmatpush.bf16.msra.mxu1 %v2225_v21  ;;  %v2394_v53 = vld [vmem:[#allocation4 + $0x1e8] sm:$0xf0]  ;;  %v95_v54 = vld.sshfl [vmem:[#allocation1] sm:$0xff pattern:$0x73625140]  ;;  %v2333_v61 = vor.u32 %v3090_v49, %v2330_v51 }
  0x2b   :  { %545 = vmatpush.bf16.msra.mxu2 %v2289_v22  ;;  %v96_v55 = vld.sshfl [vmem:[#allocation1 + $0x8] sm:$0xff pattern:$0x73625140]  ;;  %v97_v57 = vld.sshfl [vmem:[#allocation1 + $0x10] sm:$0xff pattern:$0x73625140]  ;;  %v2397_v0 = vor.u32 %v3106_v52, %v2394_v53 }
  0x2c   :  { %558 = vmatpush.bf16.msra.mxu3 %v2353_v26  ;;  %v98_v58 = vld.sshfl [vmem:[#allocation1 + $0x18] sm:$0xff pattern:$0x73625140]  ;;  %v2194_v62 = vld [vmem:[#allocation4 + $0x58] sm:$0xf0] }
  0x2d   :  { %520 = vmatpush.bf16.msra.mxu0 %v2153_v32  ;;  %105 = vst [vmem:[#allocation1 + $0x1] ss:$4 sm:$0xff] %v92_v42  ;;  %v3072_v63 = vld [vmem:[#allocation4 + $0xd4] sm:$0xf]  ;;  %v2258_v1 = vld [vmem:[#allocation4 + $0xd8] sm:$0xf0]  ;;  %v2197_v6 = vor.u32 %v3056_v56, %v2194_v62 }
  0x2e   :  { %533 = vmatpush.bf16.msra.mxu1 %v2217_v36  ;;  %v3088_v2 = vld [vmem:[#allocation4 + $0x154] sm:$0xf]  ;;  %v2322_v3 = vld [vmem:[#allocation4 + $0x158] sm:$0xf0]  ;;  %v2261_v7 = vor.u32 %v3072_v63, %v2258_v1  ;;  %v3054_v9 = vld [vmem:[#allocation4 + $0x44] sm:$0xf] }
  0x2f   :  { %546 = vmatpush.bf16.msra.mxu2 %v2281_v37  ;;  %v3104_v4 = vld [vmem:[#allocation4 + $0x1d4] sm:$0xf]  ;;  %v2386_v5 = vld [vmem:[#allocation4 + $0x1d8] sm:$0xf0]  ;;  %v2325_v8 = vor.u32 %v3088_v2, %v2322_v3  ;;  %v2186_v10 = vld [vmem:[#allocation4 + $0x48] sm:$0xf0] }
  0x30   :  { %559 = vmatpush.bf16.msra.mxu3 %v2345_v40  ;;  %v2389_v11 = vor.u32 %v3104_v4, %v2386_v5  ;;  %v3070_v12 = vld [vmem:[#allocation4 + $0xc4] sm:$0xf]  ;;  %v2250_v13 = vld [vmem:[#allocation4 + $0xc8] sm:$0xf0]  ;;  %v2189_v20 = vor.u32 %v3054_v9, %v2186_v10  ;;  %v3052_v30 = vld [vmem:[#allocation4 + $0x34] sm:$0xf] }
  0x31   :  { %565 = vmatpush.bf16.msrb.mxu0 %v2213_v41  ;;  %v3086_v14 = vld [vmem:[#allocation4 + $0x144] sm:$0xf]  ;;  %v2314_v15 = vld [vmem:[#allocation4 + $0x148] sm:$0xf0]  ;;  %v2253_v25 = vor.u32 %v3070_v12, %v2250_v13  ;;  %v2178_v31 = vld [vmem:[#allocation4 + $0x38] sm:$0xf0] }
  0x32   :  { %578 = vmatpush.bf16.msrb.mxu1 %v2277_v45  ;;  %v3102_v16 = vld [vmem:[#allocation4 + $0x1c4] sm:$0xf]  ;;  %v2378_v17 = vld [vmem:[#allocation4 + $0x1c8] sm:$0xf0]  ;;  %v2317_v34 = vor.u32 %v3086_v14, %v2314_v15  ;;  %v3068_v36 = vld [vmem:[#allocation4 + $0xb4] sm:$0xf]  ;;  %v2181_v43 = vor.u32 %v3052_v30, %v2178_v31 }
  0x33   :  { %591 = vmatpush.bf16.msrb.mxu2 %v2341_v46  ;;  %v2381_v35 = vor.u32 %v3102_v16, %v2378_v17  ;;  %v2242_v37 = vld [vmem:[#allocation4 + $0xb8] sm:$0xf0]  ;;  %v3084_v38 = vld [vmem:[#allocation4 + $0x134] sm:$0xf]  ;;  %v3050_v42 = vld [vmem:[#allocation4 + $0x24] sm:$0xf] }
  0x34   :  { %604 = vmatpush.bf16.msrb.mxu3 %v2405_v50  ;;  %v106_v18 = vld.sshfl [vmem:[#allocation1] sm:$0xff pattern:$0x73625140]  ;;  %v107_v19 = vld.sshfl [vmem:[#allocation1 + $0x8] sm:$0xff pattern:$0x73625140]  ;;  %v2245_v44 = vor.u32 %v3068_v36, %v2242_v37 }
  0x35   :  { %566 = vmatpush.bf16.msrb.mxu0 %v2205_v59  ;;  %v115_v21 = vsel %vm114_vm0, %v95_v54, %v106_v18  ;;  %v116_v22 = vsel %vm114_vm0, %v96_v55, %v107_v19  ;;  %v108_v23 = vld.sshfl [vmem:[#allocation1 + $0x10] sm:$0xff pattern:$0x73625140]  ;;  %v109_v24 = vld.sshfl [vmem:[#allocation1 + $0x18] sm:$0xff pattern:$0x73625140] }
  0x36   :  { %579 = vmatpush.bf16.msrb.mxu1 %v2269_v60  ;;  %v3469_v26 = vpack.c.bf16 %v115_v21, %v115_v21  ;;  %v3471_v27 = vpack.c.bf16 %v116_v22, %v116_v22  ;;  %v117_v28 = vsel %vm114_vm0, %v97_v57, %v108_v23  ;;  %v118_v29 = vsel %vm114_vm0, %v98_v58, %v109_v24  ;;  %v2306_v39 = vld [vmem:[#allocation4 + $0x138] sm:$0xf0]  ;;  %v3100_v40 = vld [vmem:[#allocation4 + $0x1b4] sm:$0xf]  ;;  %v2170_v45 = vld [vmem:[#allocation4 + $0x28] sm:$0xf0] }
  0x37   :  { %592 = vmatpush.bf16.msrb.mxu2 %v2333_v61  ;;  %v3475_v32 = vpack.c.bf16 %v117_v28, %v117_v28  ;;  %v3477_v33 = vpack.c.bf16 %v118_v29, %v118_v29  ;;  %v2370_v41 = vld [vmem:[#allocation4 + $0x1b8] sm:$0xf0]  ;;  %v3066_v46 = vld [vmem:[#allocation4 + $0xa4] sm:$0xf]  ;;  %v2234_v47 = vld [vmem:[#allocation4 + $0xa8] sm:$0xf0]  ;;  %v2309_v48 = vor.u32 %v3084_v38, %v2306_v39  ;;  %v2173_v54 = vor.u32 %v3050_v42, %v2170_v45 }
  0x38   :  { %605 = vmatpush.bf16.msrb.mxu3 %v2397_v0  ;;  %521 = vmatmul.bf16.vlgmr.msra.gmra.mxu0 %v3469_v26  ;;  %v2373_v49 = vor.u32 %v3100_v40, %v2370_v41  ;;  %v3082_v50 = vld [vmem:[#allocation4 + $0x124] sm:$0xf]  ;;  %v2298_v51 = vld [vmem:[#allocation4 + $0x128] sm:$0xf0]  ;;  %v2237_v55 = vor.u32 %v3066_v46, %v2234_v47  ;;  %v3048_v56 = vld [vmem:[#allocation4 + $0x14] sm:$0xf] }
  0x39   :  { %567 = vmatpush.bf16.msrb.mxu0 %v2197_v6  ;;  %534 = vmatmul.bf16.vlgmr.msra.gmra.mxu1 %v3471_v27  ;;  %v3098_v52 = vld [vmem:[#allocation4 + $0x1a4] sm:$0xf]  ;;  %v2362_v53 = vld [vmem:[#allocation4 + $0x1a8] sm:$0xf0]  ;;  %v2162_v57 = vld [vmem:[#allocation4 + $0x18] sm:$0xf0]  ;;  %v2301_v58 = vor.u32 %v3082_v50, %v2298_v51 }
  0x3a   :  { %580 = vmatpush.bf16.msrb.mxu1 %v2261_v7  ;;  %547 = vmatmul.bf16.vlgmr.msra.gmra.mxu2 %v3475_v32  ;;  %v2365_v59 = vor.u32 %v3098_v52, %v2362_v53  ;;  %v3064_v60 = vld [vmem:[#allocation4 + $0x94] sm:$0xf]  ;;  %v2226_v61 = vld [vmem:[#allocation4 + $0x98] sm:$0xf0]  ;;  %v2165_v2 = vor.u32 %v3048_v56, %v2162_v57  ;;  %v3046_v4 = vld [vmem:[#allocation4 + $0x4] sm:$0xf] }
  0x3b   :  { %593 = vmatpush.bf16.msrb.mxu2 %v2325_v8  ;;  %560 = vmatmul.bf16.vlgmr.msra.gmra.mxu3 %v3477_v33  ;;  %v3080_v62 = vld [vmem:[#allocation4 + $0x114] sm:$0xf]  ;;  %v2290_v63 = vld [vmem:[#allocation4 + $0x118] sm:$0xf0]  ;;  %v2229_v3 = vor.u32 %v3064_v60, %v2226_v61  ;;  %v2154_v5 = vld [vmem:[#allocation4 + $0x8] sm:$0xf0] }
  0x3c   :  { %606 = vmatpush.bf16.msrb.mxu3 %v2389_v11  ;;  %v3096_v0 = vld [vmem:[#allocation4 + $0x194] sm:$0xf]  ;;  %v2354_v1 = vld [vmem:[#allocation4 + $0x198] sm:$0xf0]  ;;  %v2293_v6 = vor.u32 %v3080_v62, %v2290_v63  ;;  %v3062_v8 = vld [vmem:[#allocation4 + $0x84] sm:$0xf]  ;;  %v2157_v14 = vor.u32 %v3046_v4, %v2154_v5 }
  0x3d   :  { %568 = vmatpush.bf16.msrb.mxu0 %v2189_v20  ;;  %v2357_v7 = vor.u32 %v3096_v0, %v2354_v1  ;;  %v2218_v9 = vld [vmem:[#allocation4 + $0x88] sm:$0xf0]  ;;  %v3078_v10 = vld [vmem:[#allocation4 + $0x104] sm:$0xf]  ;;  %v187_v18 = vld [vmem:[%s3663_s4] sm:$0x3] }
  0x3e   :  { %581 = vmatpush.bf16.msrb.mxu1 %v2253_v25  ;;  %v2282_v11 = vld [vmem:[#allocation4 + $0x108] sm:$0xf0]  ;;  %v3094_v12 = vld [vmem:[#allocation4 + $0x184] sm:$0xf]  ;;  %v2221_v15 = vor.u32 %v3062_v8, %v2218_v9  ;;  %v189_v19 = vperm.slane %v187_v18, 0  ;;  %v3381_v20 = vmov 2.0  }
  0x3f   :  { %594 = vmatpush.bf16.msrb.mxu2 %v2317_v34  ;;  %v2346_v13 = vld [vmem:[#allocation4 + $0x188] sm:$0xf0]  ;;  %v2285_v16 = vor.u32 %v3078_v10, %v2282_v11  ;;  %3280 = vrcp.f32 %v3381_v20  ;;  %v190_v46 = vperm.slane %v187_v18, 1  ;;  %v3140_v50 = vld [vmem:[#allocation6 + $0xec] sm:$0xf0] }
  0x40   :  { %607 = vmatpush.bf16.msrb.mxu3 %v2381_v35  ;;  %v2349_v17 = vor.u32 %v3094_v12, %v2346_v13  ;;  %v3138_v51 = vld [vmem:[#allocation6 + $0xe4] sm:$0xf]  ;;  %v2522_v57 = vld [vmem:[#allocation6 + $0xf0] sm:$0xf0]  ;;  %v3141_v62 = vld [vmem:[#allocation6 + $0xf4] sm:$0xf0] }
  0x41   :  { %569 = vmatpush.bf16.msrb.mxu0 %v2181_v43  ;;  %v2525_v61 = vor.u32 %v3138_v51, %v2522_v57  ;;  %v3139_v63 = vld [vmem:[#allocation6 + $0xec] sm:$0xf]  ;;  %v2530_v0 = vld [vmem:[#allocation6 + $0xf8] sm:$0xf0]  ;;  %v3134_v8 = vld [vmem:[#allocation6 + $0xc4] sm:$0xf] }
  0x42   :  { %582 = vmatpush.bf16.msrb.mxu1 %v2245_v44  ;;  %v2533_v4 = vor.u32 %v3139_v63, %v2530_v0  ;;  %v2506_v12 = vld [vmem:[#allocation6 + $0xd0] sm:$0xf0]  ;;  %v2512_v13 = vld [vmem:[#allocation6 + $0xc8] sm:$0xf]  ;;  %v2514_v18 = vld [vmem:[#allocation6 + $0xd8] sm:$0xf0] }
  0x43   :  { %595 = vmatpush.bf16.msrb.mxu2 %v2309_v48  ;;  %v2474_v51 = vld [vmem:[#allocation6 + $0x90] sm:$0xf0] }
  0x44   :  { %608 = vmatpush.bf16.msrb.mxu3 %v2373_v49  ;;  %v2520_v49 = vld [vmem:[#allocation6 + $0xe0] sm:$0xf] }
  0x45   :  { %570 = vmatpush.bf16.msrb.mxu0 %v2173_v54  ;;  %v3281_v24 = vpop.eup %3280  ;;  %v2521_v56 = vor.u32 %v3140_v50, %v2520_v49  ;;  %v3126_v50 = vld [vmem:[#allocation6 + $0x84] sm:$0xf] }
  0x46   :  { %583 = vmatpush.bf16.msrb.mxu1 %v2237_v55  ;;  %v627_v28 = vmul.f32 2.0, %v3281_v24  ;;  %vm631_vm1 = vweird.f32 %v3281_v24 }
  0x47   :  { %596 = vmatpush.bf16.msrb.mxu2 %v2301_v58  ;;  %v2528_v58 = vld [vmem:[#allocation6 + $0xe8] sm:$0xf] }
  0x48   :  { %609 = vmatpush.bf16.msrb.mxu3 %v2365_v59 }
  0x49   :  { %571 = vmatpush.bf16.msrb.mxu0 %v2165_v2 }
  0x4a   :  { %584 = vmatpush.bf16.msrb.mxu1 %v2229_v3  ;;  %v2529_v3 = vor.u32 %v3141_v62, %v2528_v58 }
  0x4b   :  { %597 = vmatpush.bf16.msrb.mxu2 %v2293_v6  ;;  %v2504_v6 = vld [vmem:[#allocation6 + $0xc0] sm:$0xf] }
  0x4c   :  { %610 = vmatpush.bf16.msrb.mxu3 %v2357_v7  ;;  %v3136_v7 = vld [vmem:[#allocation6 + $0xcc] sm:$0xf0] }
  0x4d   :  { %572 = vmatpush.bf16.msrb.mxu0 %v2157_v14  ;;  %v2505_v11 = vor.u32 %v3136_v7, %v2504_v6  ;;  %v3137_v14 = vld [vmem:[#allocation6 + $0xd4] sm:$0xf0] }
  0x4e   :  { %585 = vmatpush.bf16.msrb.mxu1 %v2221_v15  ;;  %v2509_v15 = vor.u32 %v3134_v8, %v2506_v12 }
  0x4f   :  { %598 = vmatpush.bf16.msrb.mxu2 %v2285_v16  ;;  %v2513_v16 = vor.u32 %v3137_v14, %v2512_v13  ;;  %v3123_v14 = vld [vmem:[#allocation6 + $0x6c] sm:$0xf] }
  0x50   :  { %611 = vmatpush.bf16.msrb.mxu3 %v2349_v17  ;;  %573 = vmatmul.bf16.vlgmr.msrb.gmra.mxu0 %v3469_v26  ;;  %v3135_v17 = vld [vmem:[#allocation6 + $0xcc] sm:$0xf] }
  0x51   :  { %586 = vmatmul.bf16.vlgmr.msrb.gmra.mxu1 %v3471_v27  ;;  %936 = vmatpush.bf16.msra.mxu0 %v2521_v56 }
  0x52   :  { %599 = vmatmul.bf16.vlgmr.msrb.gmra.mxu2 %v3475_v32  ;;  %949 = vmatpush.bf16.msra.mxu1 %v2525_v61 }
  0x53   :  { %612 = vmatmul.bf16.vlgmr.msrb.gmra.mxu3 %v3477_v33  ;;  %v628_v33 = vsub.f32 1.0, %v627_v28  ;;  %962 = vmatpush.bf16.msra.mxu2 %v2529_v3  ;;  %v3130_v28 = vld [vmem:[#allocation6 + $0xa4] sm:$0xf]  ;;  %v2456_v3 = vld [vmem:[#allocation6 + $0x60] sm:$0xf] }
  0x54   :  { %975 = vmatpush.bf16.msra.mxu3 %v2533_v4  ;;  %v3124_v4 = vld [vmem:[#allocation6 + $0x6c] sm:$0xf0] }
  0x55   :  { %v629_v37 = vmul.f32 %v3281_v24, %v628_v33  ;;  %937 = vmatpush.bf16.msra.mxu0 %v2505_v11  ;;  %v2490_v33 = vld [vmem:[#allocation6 + $0xb0] sm:$0xf0]  ;;  %v2457_v8 = vor.u32 %v3124_v4, %v2456_v3  ;;  %v3125_v11 = vld [vmem:[#allocation6 + $0x74] sm:$0xf0]  ;;  %v3111_v4 = vld [vmem:[#allocation6 + $0xc] sm:$0xf] }
  0x56   :  { %950 = vmatpush.bf16.msra.mxu1 %v2509_v15  ;;  %v2466_v15 = vld [vmem:[#allocation6 + $0x78] sm:$0xf0]  ;;  %v3113_v3 = vld [vmem:[#allocation6 + $0x14] sm:$0xf0] }
  0x57   :  { %v630_v45 = vadd.f32 %v3281_v24, %v629_v37  ;;  %963 = vmatpush.bf16.msra.mxu2 %v2513_v16  ;;  %v2493_v37 = vor.u32 %v3130_v28, %v2490_v33  ;;  %v2442_v28 = vld [vmem:[#allocation6 + $0x50] sm:$0xf0]  ;;  %v3121_v33 = vld [vmem:[#allocation6 + $0x54] sm:$0xf0] }
  0x59   :  { %v3496_v59 = vsel %vm631_vm1, %v3281_v24, %v630_v45  ;;  %v2488_v24 = vld [vmem:[#allocation6 + $0xa0] sm:$0xf] }
  0x5a   :  { %951 = vmatpush.bf16.msra.mxu1 %v2493_v37  ;;  %v2472_v45 = vld [vmem:[#allocation6 + $0x80] sm:$0xf] }
  0xb5   :  { %v522_v21 = vpop.f32.mrf.mxu0 }
  0xb6   :  { %v535_v22 = vpop.f32.mrf.mxu1  ;;  %v523_v23 = vadd.f32 %v522_v21, %v189_v19  ;;  %v2517_v21 = vor.u32 %v3135_v17, %v2514_v18  ;;  %v2469_v18 = vor.u32 %v3123_v14, %v2466_v15 }
  0xb8   :  { %v536_v25 = vadd.f32 %v535_v22, %v523_v23  ;;  %976 = vmatpush.bf16.msra.mxu3 %v2517_v21  ;;  %v3120_v21 = vld [vmem:[#allocation6 + $0x4c] sm:$0xf0] }
  0xbd   :  { %v548_v26 = vpop.f32.mrf.mxu2  ;;  %v524_v30 = vpop.f32.mrf.mxu0 }
  0xbe   :  { %v561_v29 = vpop.f32.mrf.mxu3  ;;  %v549_v27 = vadd.f32 %v548_v26, %v536_v25  ;;  %v537_v31 = vpop.f32.mrf.mxu1  ;;  %v3132_v25 = vld [vmem:[#allocation6 + $0xac] sm:$0xf0] }
  0xc0   :  { %v3490_v32 = vadd.f32 %v561_v29, %v549_v27 }
  0xc2   :  { %v619_v34 = vsel %vm114_vm0, %v3490_v32, 0.0  ;;  %v665_v35 = vrot.slane %v3490_v32, 2 }
  0xc3   :  { %v620_v36 = vrot.slane %v619_v34, 4 }
  0xc4   :  { %v667_v38 = vsel %vm114_vm0, %v665_v35, 0.0  ;;  %v3133_v35 = vld [vmem:[#allocation6 + $0xb4] sm:$0xf0] }
  0xc5   :  { %v621_v39 = vadd.f32 %v620_v36, %v619_v34  ;;  %v668_v40 = vrot.slane %v667_v38, 4  ;;  %v550_v41 = vpop.f32.mrf.mxu2  ;;  %v2496_v34 = vld [vmem:[#allocation6 + $0xa8] sm:$0xf]  ;;  %v2489_v36 = vor.u32 %v3132_v25, %v2488_v24  ;;  %v3118_v25 = vld [vmem:[#allocation6 + $0x44] sm:$0xf] }
  0xc6   :  { %v563_v42 = vpop.f32.mrf.mxu3 }
  0xc7   :  { %v622_v43 = vrot.slane %v621_v39, 2  ;;  %v669_v44 = vadd.f32 %v668_v40, %v667_v38  ;;  %v2497_v38 = vor.u32 %v3133_v35, %v2496_v34  ;;  %v2498_v40 = vld [vmem:[#allocation6 + $0xb8] sm:$0xf0]  ;;  %938 = vmatpush.bf16.msra.mxu0 %v2489_v36  ;;  %v3119_v34 = vld [vmem:[#allocation6 + $0x4c] sm:$0xf] }
  0xc8   :  { %v2450_v35 = vld [vmem:[#allocation6 + $0x58] sm:$0xf0] }
  0xc9   :  { %v623_v47 = vadd.f32 %v622_v43, %v621_v39  ;;  %v670_v48 = vrot.slane %v669_v44, 2  ;;  %v3131_v39 = vld [vmem:[#allocation6 + $0xac] sm:$0xf]  ;;  %964 = vmatpush.bf16.msra.mxu2 %v2497_v38  ;;  %v2453_v38 = vor.u32 %v3119_v34, %v2450_v35 }
  0xca   :  { %v2501_v43 = vor.u32 %v3131_v39, %v2498_v40 }
  0xcb   :  { %v624_v52 = vrot.slane %v623_v47, 1  ;;  %v671_v53 = vadd.f32 %v670_v48, %v669_v44 }
  0xcc   :  { %977 = vmatpush.bf16.msra.mxu3 %v2501_v43  ;;  %v3116_v43 = vld [vmem:[#allocation6 + $0x2c] sm:$0xf0] }
  0xcd   :  { %v574_v54 = vpop.f32.mrf.mxu0  ;;  %v625_v1 = vadd.f32 %v624_v52, %v623_v47  ;;  %v672_v2 = vrot.slane %v671_v53, 1 }
  0xce   :  { %v587_v55 = vpop.f32.mrf.mxu1  ;;  %v575_v60 = vadd.f32 %v574_v54, %v190_v46  ;;  %v3128_v46 = vld [vmem:[#allocation6 + $0x8c] sm:$0xf0]  ;;  %v2480_v54 = vld [vmem:[#allocation6 + $0x88] sm:$0xf] }
  0xcf   :  { %v633_v9 = vmul.f32 %v3496_v59, %v625_v1  ;;  %v673_v10 = vadd.f32 %v672_v2, %v671_v53  ;;  %v2473_v49 = vor.u32 %v3128_v46, %v2472_v45  ;;  %v2477_v53 = vor.u32 %v3126_v50, %v2474_v51  ;;  %v2482_v1 = vld [vmem:[#allocation6 + $0x98] sm:$0xf0]  ;;  %v3114_v45 = vld [vmem:[#allocation6 + $0x24] sm:$0xf]  ;;  %v2426_v46 = vld [vmem:[#allocation6 + $0x30] sm:$0xf0] }
  0xd0   :  { %v588_v5 = vadd.f32 %v587_v55, %v575_v60  ;;  %v3129_v55 = vld [vmem:[#allocation6 + $0x94] sm:$0xf0]  ;;  %v3127_v60 = vld [vmem:[#allocation6 + $0x8c] sm:$0xf]  ;;  %v2429_v51 = vor.u32 %v3114_v45, %v2426_v46 }
  0xd1   :  { %v3500_v19 = vsub.f32 %v3490_v32, %v633_v9  ;;  %v674_v20 = vmul.f32 %v673_v10, %v3496_v59  ;;  %v2481_v58 = vor.u32 %v3129_v55, %v2480_v54  ;;  %939 = vmatpush.bf16.msra.mxu0 %v2473_v49  ;;  %952 = vmatpush.bf16.msra.mxu1 %v2477_v53  ;;  %v2458_v9 = vld [vmem:[#allocation6 + $0x70] sm:$0xf0]  ;;  %v2464_v10 = vld [vmem:[#allocation6 + $0x68] sm:$0xf]  ;;  %v3115_v54 = vld [vmem:[#allocation6 + $0x2c] sm:$0xf] }
  0xd2   :  { %v2485_v2 = vor.u32 %v3127_v60, %v2482_v1  ;;  %v2465_v13 = vor.u32 %v3125_v11, %v2464_v10  ;;  %v2434_v55 = vld [vmem:[#allocation6 + $0x38] sm:$0xf0]  ;;  %v3112_v60 = vld [vmem:[#allocation6 + $0xc] sm:$0xf0] }
  0xd3   :  { %v635_v26 = vmul.f32 %v3500_v19, %v3500_v19  ;;  %v3506_v29 = vsub.f32 %v3490_v32, %v674_v20  ;;  %965 = vmatpush.bf16.msra.mxu2 %v2481_v58  ;;  %v2440_v20 = vld [vmem:[#allocation6 + $0x40] sm:$0xf] }
  0xd4   :  { %978 = vmatpush.bf16.msra.mxu3 %v2485_v2  ;;  %v2441_v24 = vor.u32 %v3120_v21, %v2440_v20  ;;  %v2416_v2 = vld [vmem:[#allocation6 + $0x8] sm:$0xf] }
  0xd5   :  { %v600_v22 = vpop.f32.mrf.mxu2  ;;  %v576_v30 = vpop.f32.mrf.mxu0  ;;  %v636_v41 = vsel %vm114_vm0, %v635_v26, 0.0  ;;  %v676_v42 = vmul.f32 %v3506_v29, %v3506_v29  ;;  %940 = vmatpush.bf16.msra.mxu0 %v2457_v8  ;;  %v2448_v26 = vld [vmem:[#allocation6 + $0x48] sm:$0xf] }
  0xd6   :  { %v613_v23 = vpop.f32.mrf.mxu3  ;;  %v601_v27 = vadd.f32 %v600_v22, %v588_v5  ;;  %v589_v31 = vpop.f32.mrf.mxu1  ;;  %v637_v44 = vrot.slane %v636_v41, 4  ;;  %v3122_v5 = vld [vmem:[#allocation6 + $0x64] sm:$0xf]  ;;  %v3515_v22 = vstv %s702_s29  ;;  %v2449_v37 = vor.u32 %v3121_v33, %v2448_v26 }
  0xd7   :  { %v678_v47 = vrot.slane %v676_v42, 2  ;;  %v2461_v12 = vor.u32 %v3122_v5, %v2458_v9  ;;  %966 = vmatpush.bf16.msra.mxu2 %v2465_v13  ;;  %v2445_v31 = vor.u32 %v3118_v25, %v2442_v28 }
  0xd8   :  { %v614_v32 = vadd.f32 %v613_v23, %v601_v27  ;;  %v638_v52 = vadd.f32 %v637_v44, %v636_v41  ;;  %v705_v23 = vstv %s3659_s0  ;;  %979 = vmatpush.bf16.msra.mxu3 %v2469_v18 }
  0xd9   :  { %v680_v56 = vsel %vm114_vm0, %v678_v47, 0.0  ;;  %953 = vmatpush.bf16.msra.mxu1 %v2461_v12  ;;  %941 = vmatpush.bf16.msra.mxu0 %v2441_v24  ;;  %v2432_v47 = vld [vmem:[#allocation6 + $0x28] sm:$0xf] }
  0xda   :  { %v711_v48 = vmul.f32 2.0, %v614_v32  ;;  %v639_v61 = vrot.slane %v638_v52, 2  ;;  %v681_v62 = vrot.slane %v680_v56, 4  ;;  %v2424_v32 = vld [vmem:[#allocation6 + $0x20] sm:$0xf] }
  0xdb   :  { %967 = vmatpush.bf16.msra.mxu2 %v2449_v37  ;;  %v2425_v44 = vor.u32 %v3116_v43, %v2424_v32  ;;  %v3279_v37 = vld [vmem:[%s3665_s6] ss:$0 sm:$0xff] }
  0xdc   :  { %v712_v57 = vmul.f32 1.442695, %v711_v48  ;;  %v640_v6 = vadd.f32 %v639_v61, %v638_v52  ;;  %v682_v7 = vadd.f32 %v681_v62, %v680_v56  ;;  %v3117_v52 = vld [vmem:[#allocation6 + $0x34] sm:$0xf0]  ;;  %980 = vmatpush.bf16.msra.mxu3 %v2453_v38  ;;  %v2408_v56 = vld [vmem:[#allocation6] sm:$0xf] }
  0xdd   :  { %v602_v63 = vpop.f32.mrf.mxu2  ;;  %954 = vmatpush.bf16.msra.mxu1 %v2445_v31  ;;  %v2433_v53 = vor.u32 %v3117_v52, %v2432_v47  ;;  %942 = vmatpush.bf16.msra.mxu0 %v2425_v44  ;;  %v3110_v61 = vld [vmem:[#allocation6 + $0x4] sm:$0xf]  ;;  %v2410_v62 = vld [vmem:[#allocation6 + $0x10] sm:$0xf0] }
  0xde   :  { %v615_v0 = vpop.f32.mrf.mxu3  ;;  %3282 = vpow2.f32 %v712_v57  ;;  %v641_v16 = vrot.slane %v640_v6, 1  ;;  %v683_v17 = vrot.slane %v682_v7, 2  ;;  %v2437_v63 = vor.u32 %v3115_v54, %v2434_v55  ;;  %v3168_v54 = vld [vmem:[#allocation8 + $0xcc] sm:$0xf0]  ;;  %v2760_v55 = vld [vmem:[#allocation8 + $0x1c0] sm:$0xf] }
  0xdf   :  { %968 = vmatpush.bf16.msra.mxu2 %v2433_v53  ;;  %v2409_v0 = vor.u32 %v3112_v60, %v2408_v56  ;;  %v2413_v1 = vor.u32 %v3110_v61, %v2410_v62  ;;  %v2632_v53 = vld [vmem:[#allocation8 + $0xc0] sm:$0xf]  ;;  %v3236_v61 = vld [vmem:[#allocation8 + $0x2ec] sm:$0xf0] }
  0xe0   :  { %v642_v27 = vadd.f32 %v641_v16, %v640_v6  ;;  %v684_v30 = vadd.f32 %v683_v17, %v682_v7  ;;  %v2417_v6 = vor.u32 %v3113_v3, %v2416_v2  ;;  %v2418_v7 = vld [vmem:[#allocation6 + $0x18] sm:$0xf0]  ;;  %981 = vmatpush.bf16.msra.mxu3 %v2437_v63  ;;  %v2633_v56 = vor.u32 %v3168_v54, %v2632_v53  ;;  %v2904_v60 = vld [vmem:[#allocation8 + $0x2e0] sm:$0xf]  ;;  %v3164_v3 = vld [vmem:[#allocation8 + $0xac] sm:$0xf0] }
  0xe1   :  { %955 = vmatpush.bf16.msra.mxu1 %v2429_v51  ;;  %v2421_v8 = vor.u32 %v3111_v4, %v2418_v7  ;;  %943 = vmatpush.bf16.msra.mxu0 %v2409_v0  ;;  %v3032_v62 = vld [vmem:[#allocation8 + $0x3e0] sm:$0xf]  ;;  %v2905_v63 = vor.u32 %v3236_v61, %v2904_v60  ;;  %v3268_v0 = vld [vmem:[#allocation8 + $0x3ec] sm:$0xf0] }
  0xe2   :  { %v643_v39 = vmul.f32 %v642_v27, %v3496_v59  ;;  %v685_v40 = vrot.slane %v684_v30, 1  ;;  %v2616_v2 = vld [vmem:[#allocation8 + $0xa0] sm:$0xf] }
  0xe3   :  { %969 = vmatpush.bf16.msra.mxu2 %v2417_v6  ;;  %v2744_v4 = vld [vmem:[#allocation8 + $0x1a0] sm:$0xf]  ;;  %v3196_v6 = vld [vmem:[#allocation8 + $0x1ac] sm:$0xf0] }
  0xe4   :  { %v3283_v36 = vpop.eup %3282  ;;  %v644_v48 = vadd.f32 1e-05, %v643_v39  ;;  %v686_v49 = vadd.f32 %v685_v40, %v684_v30  ;;  %982 = vmatpush.bf16.msra.mxu3 %v2421_v8  ;;  %v3278_v30 = vld [vmem:[%s3664_s5] ss:$0 sm:$0xff]  ;;  %v2745_v7 = vor.u32 %v3196_v6, %v2744_v4  ;;  %v2888_v8 = vld [vmem:[#allocation8 + $0x2c0] sm:$0xf] }
  0xe5   :  { %v714_v41 = vmul.f32 %v3283_v36, %v3515_v22  ;;  %v715_v42 = vmul.f32 %v3283_v36, %v705_v23  ;;  %956 = vmatpush.bf16.msra.mxu1 %v2413_v1  ;;  %v3033_v1 = vor.u32 %v3268_v0, %v3032_v62 }
  0xe6   :  { %3284 = vrsqrt.f32 %v644_v48  ;;  %v687_v57 = vmul.f32 %v686_v49, %v3496_v59  ;;  %vm651_vm3 = vweird.f32 %v644_v48  ;;  %v3172_v49 = vld [vmem:[#allocation8 + $0xec] sm:$0xf0] }
  0xe7   :  { %v717_v50 = vrot.slane %v715_v42, 2  ;;  %1948 = vmatpush.bf16.msrb.mxu2 %v2905_v63  ;;  %v3180_v63 = vld [vmem:[#allocation8 + $0x12c] sm:$0xf0] }
  0xe8   :  { %v688_v5 = vadd.f32 1e-05, %v687_v57  ;;  %v3200_v57 = vld [vmem:[#allocation8 + $0x1cc] sm:$0xf0]  ;;  %1961 = vmatpush.bf16.msrb.mxu3 %v3033_v1  ;;  %v2824_v1 = vld [vmem:[#allocation8 + $0x240] sm:$0xf] }
  0xe9   :  { %v3527_v58 = vadd.f32 %v717_v50, %v714_v41  ;;  %v2776_v50 = vld [vmem:[#allocation8 + $0x1e0] sm:$0xf] }
  0xea   :  { %vm695_vm6 = vweird.f32 %v688_v5 }
  0xeb   :  { %3286 = vrsqrt.f32 %v3527_v58  ;;  %vm727_vm8 = vcmp.eq.f32.partialorder %v3527_v58, inf  ;;  %v730_v44 = vand.u32 2147483648, %v3527_v58  ;;  %vm729_vm9 = vcmp.eq.f32.partialorder %v3527_v58, 0.0 }
  0xec   :  { %3288 = vrsqrt.f32 %v688_v5  ;;  %v3285_v9 = vpop.eup %3284 }
  0xed   :  { %v646_v10 = vmul.f32 %v3285_v9, %v644_v48  ;;  %vm652_vm2 = vweird.f32 %v3285_v9 }
  0xee   :  { %vm653_vm4 = vmor %vm651_vm3, %vm652_vm2 }
  0xef   :  { %v647_v12 = vmul.f32 %v3285_v9, %v646_v10  ;;  %v3016_v10 = vld [vmem:[#allocation8 + $0x3c0] sm:$0xf] }
  0xf1   :  { %v3287_v11 = vpop.eup %3286  ;;  %v648_v15 = vmul.f32 0.5, %v647_v12  ;;  %v3264_v12 = vld [vmem:[#allocation8 + $0x3cc] sm:$0xf0] }
  0xf2   :  { %v721_v13 = vmul.f32 %v3287_v11, %v3527_v58  ;;  %v3289_v14 = vpop.eup %3288 }
  0xf3   :  { %v690_v16 = vmul.f32 %v3289_v14, %v688_v5  ;;  %v649_v18 = vsub.f32 1.5, %v648_v15  ;;  %vm696_vm5 = vweird.f32 %v3289_v14  ;;  %v2617_v5 = vor.u32 %v3164_v3, %v2616_v2  ;;  %v3160_v15 = vld [vmem:[#allocation8 + $0x8c] sm:$0xf0]  ;;  %v2952_v3 = vld [vmem:[#allocation8 + $0x340] sm:$0xf] }
  0xf4   :  { %v722_v17 = vmul.f32 %v3287_v11, %v721_v13  ;;  %vm697_vm7 = vmor %vm695_vm6, %vm696_vm5  ;;  %v3017_v13 = vor.u32 %v3264_v12, %v3016_v10  ;;  %v3216_v2 = vld [vmem:[#allocation8 + $0x24c] sm:$0xf0]  ;;  %v2536_v12 = vld [vmem:[#allocation8] sm:$0xf] }
  0xf5   :  { %v691_v20 = vmul.f32 %v3289_v14, %v690_v16  ;;  %v650_v24 = vmul.f32 %v3285_v9, %v649_v18  ;;  %v2728_v16 = vld [vmem:[#allocation8 + $0x180] sm:$0xf]  ;;  %v3192_v18 = vld [vmem:[#allocation8 + $0x18c] sm:$0xf0] }
  0xf6   :  { %v723_v21 = vmul.f32 0.5, %v722_v17  ;;  %1962 = vmatpush.bf16.msrb.mxu3 %v3017_v13  ;;  %v3144_v13 = vld [vmem:[#allocation8 + $0xc] sm:$0xf0] }
  0xf7   :  { %v692_v25 = vmul.f32 0.5, %v691_v20  ;;  %v654_v28 = vsel %vm653_vm4, %v3285_v9, %v650_v24  ;;  %v3232_v9 = vld [vmem:[#allocation8 + $0x2cc] sm:$0xf0]  ;;  %v2729_v20 = vor.u32 %v3192_v18, %v2728_v16 }
  0xf8   :  { %v655_v27 = vmul.f32 %v654_v28, %v3500_v19  ;;  %v724_v31 = vsub.f32 1.5, %v723_v21  ;;  %v2872_v21 = vld [vmem:[#allocation8 + $0x2a0] sm:$0xf]  ;;  %v3228_v24 = vld [vmem:[#allocation8 + $0x2ac] sm:$0xf0] }
  0xf9   :  { %v693_v26 = vsub.f32 1.5, %v692_v25  ;;  %v3000_v25 = vld [vmem:[#allocation8 + $0x3a0] sm:$0xf]  ;;  %v2873_v28 = vor.u32 %v3228_v24, %v2872_v21  ;;  %v3176_v16 = vld [vmem:[#allocation8 + $0x10c] sm:$0xf0] }
  0xfa   :  { %v659_v35 = vmul.f32 %v3278_v30, %v655_v27  ;;  %v725_v38 = vmul.f32 %v3287_v11, %v724_v31  ;;  %v2889_v11 = vor.u32 %v3232_v9, %v2888_v8  ;;  %v3156_v31 = vld [vmem:[#allocation8 + $0x6c] sm:$0xf0]  ;;  %v2650_v24 = vld [vmem:[#allocation8 + $0xf0] sm:$0xf0] }
  0xfb   :  { %v694_v33 = vmul.f32 %v3289_v14, %v693_v26  ;;  %v3260_v26 = vld [vmem:[#allocation8 + $0x3ac] sm:$0xf0] }
  0xfc   :  { %v663_v40 = vadd.f32 %v3279_v37, %v659_v35  ;;  %v726_v41 = vmul.f32 %v725_v38, %v3527_v58  ;;  %1949 = vmatpush.bf16.msrb.mxu2 %v2889_v11  ;;  %v3001_v27 = vor.u32 %v3260_v26, %v3000_v25  ;;  %v2856_v38 = vld [vmem:[#allocation8 + $0x280] sm:$0xf]  ;;  %v3248_v8 = vld [vmem:[#allocation8 + $0x34c] sm:$0xf0]  ;;  %v3202_v25 = vld [vmem:[#allocation8 + $0x1e4] sm:$0xf] }
  0xfd   :  { %v698_v34 = vsel %vm697_vm7, %v3289_v14, %v694_v33  ;;  %v2600_v14 = vld [vmem:[#allocation8 + $0x80] sm:$0xf]  ;;  %v2953_v11 = vor.u32 %v3248_v8, %v2952_v3  ;;  %v3266_v3 = vld [vmem:[#allocation8 + $0x3e4] sm:$0xf]  ;;  %vm2138_vm7 = vcmask 1045508  }
  0xfe   :  { %v699_v36 = vmul.f32 %v698_v34, %v3506_v29  ;;  %v704_v32 = vmul.f32 %v3515_v22, %v663_v40  ;;  %v728_v43 = vsel %vm727_vm8, %v3527_v58, %v726_v41  ;;  %v3204_v22 = vld [vmem:[#allocation8 + $0x1ec] sm:$0xf0]  ;;  %v2761_v58 = vor.u32 %v3200_v57, %v2760_v55  ;;  %v2712_v33 = vld [vmem:[#allocation8 + $0x160] sm:$0xf]  ;;  %v3552_v34 = vld [vmem:[%s3667_s8] sm:$0xf]  ;;  %1963 = vmatpush.bf16.msrb.mxu3 %v3001_v27 }
  0xff   :  { %v731_v46 = vsel %vm729_vm9, %v730_v44, %v728_v43  ;;  %v2777_v52 = vor.u32 %v3204_v22, %v2776_v50  ;;  %v2601_v17 = vor.u32 %v3160_v15, %v2600_v14  ;;  %v2984_v40 = vld [vmem:[#allocation8 + $0x380] sm:$0xf]  ;;  %v3256_v41 = vld [vmem:[#allocation8 + $0x38c] sm:$0xf0]  ;;  %v768_v44 = vperm.slane %v3552_v34, 0 }
 0x100   :  { %v700_v39 = vmul.f32 %v3278_v30, %v699_v36  ;;  %v2584_v30 = vld [vmem:[#allocation8 + $0x60] sm:$0xf]  ;;  %1950 = vmatpush.bf16.msrb.mxu2 %v2873_v28  ;;  %v3188_v36 = vld [vmem:[#allocation8 + $0x16c] sm:$0xf0]  ;;  %v770_v61 = vperm.slane %v3552_v34, 2  ;;  %v771_v6 = vperm.slane %v3552_v34, 3  ;;  %v2537_v14 = vor.u32 %v3144_v13, %v2536_v12 }
 0x101   :  { %1935 = vmatpush.bf16.msrb.mxu1 %v2777_v52  ;;  %v2585_v35 = vor.u32 %v3156_v31, %v2584_v30  ;;  %v2696_v43 = vld [vmem:[#allocation8 + $0x140] sm:$0xf]  ;;  %v3252_v22 = vld [vmem:[#allocation8 + $0x36c] sm:$0xf0]  ;;  %v2778_v28 = vld [vmem:[#allocation8 + $0x1f0] sm:$0xf0] }
 0x102   :  { %v701_v19 = vadd.f32 %v3279_v37, %v700_v39  ;;  %v2713_v37 = vor.u32 %v3188_v36, %v2712_v33  ;;  %v3224_v39 = vld [vmem:[#allocation8 + $0x28c] sm:$0xf0]  ;;  %v2968_v50 = vld [vmem:[#allocation8 + $0x360] sm:$0xf]  ;;  %v2781_v31 = vor.u32 %v3202_v25, %v2778_v28  ;;  %v2890_v25 = vld [vmem:[#allocation8 + $0x2d0] sm:$0xf0] }
 0x103   :  { %v2969_v54 = vor.u32 %v3252_v22, %v2968_v50  ;;  %v2552_v55 = vld [vmem:[#allocation8 + $0x20] sm:$0xf]  ;;  %v3262_v28 = vld [vmem:[#allocation8 + $0x3c4] sm:$0xf]  ;;  %vm2140_vm8 = vcmask 1043456  }
 0x104   :  { %v706_v42 = vmul.f32 %v705_v23, %v701_v19  ;;  %v2648_v23 = vld [vmem:[#allocation8 + $0xe0] sm:$0xf]  ;;  %v2857_v19 = vor.u32 %v3224_v39, %v2856_v38 }
 0x105   :  { %v2649_v51 = vor.u32 %v3172_v49, %v2648_v23  ;;  %1936 = vmatpush.bf16.msrb.mxu1 %v2761_v58  ;;  %v2840_v23 = vld [vmem:[#allocation8 + $0x260] sm:$0xf]  ;;  %v3220_v49 = vld [vmem:[#allocation8 + $0x26c] sm:$0xf0] }
 0x106   :  { %v708_v29 = vrot.slane %v706_v42, 2  ;;  %v2985_v42 = vor.u32 %v3256_v41, %v2984_v40  ;;  %1951 = vmatpush.bf16.msrb.mxu2 %v2857_v19  ;;  %v2680_v57 = vld [vmem:[#allocation8 + $0x120] sm:$0xf]  ;;  %v3244_v41 = vld [vmem:[#allocation8 + $0x32c] sm:$0xf0] }
 0x107   :  { %1922 = vmatpush.bf16.msrb.mxu0 %v2649_v51  ;;  %v2841_v51 = vor.u32 %v3220_v49, %v2840_v23  ;;  %v2681_v0 = vor.u32 %v3180_v63, %v2680_v57  ;;  %v2664_v15 = vld [vmem:[#allocation8 + $0x100] sm:$0xf]  ;;  %v2762_v23 = vld [vmem:[#allocation8 + $0x1d0] sm:$0xf0] }
 0x108   :  { %v710_v45 = vadd.f32 %v708_v29, %v704_v32  ;;  %v2568_v32 = vld [vmem:[#allocation8 + $0x40] sm:$0xf]  ;;  %v3152_v29 = vld [vmem:[#allocation8 + $0x4c] sm:$0xf0]  ;;  %1964 = vmatpush.bf16.msrb.mxu3 %v2985_v42  ;;  %v2665_v21 = vor.u32 %v3176_v16, %v2664_v15 }
 0x109   :  { %1937 = vmatpush.bf16.msrb.mxu1 %v2745_v7  ;;  %v2825_v7 = vor.u32 %v3216_v2, %v2824_v1  ;;  %v2808_v33 = vld [vmem:[#allocation8 + $0x220] sm:$0xf]  ;;  %v2906_v2 = vld [vmem:[#allocation8 + $0x2f0] sm:$0xf0] }
 0x10a   :  { %v732_v47 = vadd.f32 %v731_v46, %v710_v45  ;;  %v769_v45 = vperm.slane %v3552_v34, 1  ;;  %v2569_v46 = vor.u32 %v3152_v29, %v2568_v32  ;;  %1952 = vmatpush.bf16.msrb.mxu2 %v2841_v51  ;;  %v3212_v34 = vld [vmem:[#allocation8 + $0x22c] sm:$0xf0]  ;;  %v3166_v29 = vld [vmem:[#allocation8 + $0xc4] sm:$0xf] }
 0x10b   :  { %1923 = vmatpush.bf16.msrb.mxu0 %v2633_v56  ;;  %v3148_v56 = vld [vmem:[#allocation8 + $0x2c] sm:$0xf0]  ;;  %v2809_v42 = vor.u32 %v3212_v34, %v2808_v33  ;;  %v2792_v49 = vld [vmem:[#allocation8 + $0x200] sm:$0xf]  ;;  %v3158_v34 = vld [vmem:[#allocation8 + $0x84] sm:$0xf] }
 0x10c   :  { %v733_v48 = vpack.c.bf16 %v732_v47, %v732_v47  ;;  %v3184_v47 = vld [vmem:[#allocation8 + $0x14c] sm:$0xf0]  ;;  %v2553_v62 = vor.u32 %v3148_v56, %v2552_v55  ;;  %1965 = vmatpush.bf16.msrb.mxu3 %v2969_v54  ;;  %v2920_v54 = vld [vmem:[#allocation8 + $0x300] sm:$0xf] }
 0x10d   :  { %1938 = vmatpush.bf16.msrb.mxu1 %v2729_v20 }
 0x10e   :  { %944 = vmatmul.bf16.vlgmr.msra.gmra.mxu0 %v733_v48  ;;  %957 = vmatmul.bf16.vlgmr.msra.gmra.mxu1 %v733_v48 }
 0x10f   :  { %970 = vmatmul.bf16.vlgmr.msra.gmra.mxu2 %v733_v48  ;;  %983 = vmatmul.bf16.vlgmr.msra.gmra.mxu3 %v733_v48  ;;  %v2697_v48 = vor.u32 %v3184_v47, %v2696_v43  ;;  %v2634_v43 = vld [vmem:[#allocation8 + $0xd0] sm:$0xf0] }
 0x110   :  { %1924 = vmatpush.bf16.msrb.mxu0 %v2617_v5  ;;  %1953 = vmatpush.bf16.msrb.mxu2 %v2825_v7  ;;  %v2637_v22 = vor.u32 %v3166_v29, %v2634_v43  ;;  %v3226_v43 = vld [vmem:[#allocation8 + $0x2a4] sm:$0xf] }
 0x111   :  { %1939 = vmatpush.bf16.msrb.mxu1 %v2713_v37  ;;  %1966 = vmatpush.bf16.msrb.mxu3 %v2953_v11  ;;  %v3194_v11 = vld [vmem:[#allocation8 + $0x1a4] sm:$0xf] }
 0x114   :  { %1925 = vmatpush.bf16.msrb.mxu0 %v2601_v17  ;;  %v3170_v17 = vld [vmem:[#allocation8 + $0xe4] sm:$0xf]  ;;  %1954 = vmatpush.bf16.msrb.mxu2 %v2809_v42 }
 0x115   :  { %1940 = vmatpush.bf16.msrb.mxu1 %v2697_v48  ;;  %v2653_v30 = vor.u32 %v3170_v17, %v2650_v24  ;;  %v2746_v17 = vld [vmem:[#allocation8 + $0x1b0] sm:$0xf0] }
 0x116   :  { %v2749_v24 = vor.u32 %v3194_v11, %v2746_v17 }
 0x118   :  { %1926 = vmatpush.bf16.msrb.mxu0 %v2585_v35  ;;  %v2936_v35 = vld [vmem:[#allocation8 + $0x320] sm:$0xf] }
 0x119   :  { %1941 = vmatpush.bf16.msrb.mxu1 %v2681_v0  ;;  %v2937_v32 = vor.u32 %v3244_v41, %v2936_v35  ;;  %v2602_v35 = vld [vmem:[#allocation8 + $0x90] sm:$0xf0] }
 0x11a   :  { %v2730_v41 = vld [vmem:[#allocation8 + $0x190] sm:$0xf0] }
 0x11b   :  { %1967 = vmatpush.bf16.msrb.mxu3 %v2937_v32 }
 0x11c   :  { %1927 = vmatpush.bf16.msrb.mxu0 %v2569_v46 }
 0x11d   :  { %1942 = vmatpush.bf16.msrb.mxu1 %v2665_v21 }
 0x120   :  { %1928 = vmatpush.bf16.msrb.mxu0 %v2553_v62  ;;  %v3234_v62 = vld [vmem:[#allocation8 + $0x2e4] sm:$0xf] }
 0x121   :  { %1987 = vmatpush.bf16.msra.mxu1 %v2781_v31  ;;  %v2909_v7 = vor.u32 %v3234_v62, %v2906_v2 }
 0x124   :  { %1929 = vmatpush.bf16.msrb.mxu0 %v2537_v14 }
 0x128   :  { %1974 = vmatpush.bf16.msra.mxu0 %v2653_v30 }
 0x12c   :  { %1975 = vmatpush.bf16.msra.mxu0 %v2637_v22  ;;  %v3186_v22 = vld [vmem:[#allocation8 + $0x164] sm:$0xf] }
 0x18b   :  { %v945_v52 = vpop.f32.mrf.mxu0  ;;  %v958_v53 = vpop.f32.mrf.mxu1 }
 0x18c   :  { %v3556_v58 = vadd.f32 %v945_v52, %v768_v44  ;;  %v3558_v60 = vadd.f32 %v958_v53, %v769_v45  ;;  %v3198_v44 = vld [vmem:[#allocation8 + $0x1c4] sm:$0xf]  ;;  %v3208_v53 = vld [vmem:[#allocation8 + $0x20c] sm:$0xf0] }
 0x18d   :  { %v2765_v52 = vor.u32 %v3198_v44, %v2762_v23  ;;  %v2793_v57 = vor.u32 %v3208_v53, %v2792_v49  ;;  %v2874_v44 = vld [vmem:[#allocation8 + $0x2b0] sm:$0xf0] }
 0x18e   :  { %v990_v4 = vsel %vm114_vm0, %v3556_v58, 0.0  ;;  %v997_v5 = vsel %vm114_vm0, %v3558_v60, 0.0 }
 0x18f   :  { %v991_v9 = vrot.slane %v990_v4, 4  ;;  %v998_v10 = vrot.slane %v997_v5, 4  ;;  %1988 = vmatpush.bf16.msra.mxu1 %v2765_v52  ;;  %1955 = vmatpush.bf16.msrb.mxu2 %v2793_v57 }
 0x191   :  { %v992_v18 = vadd.f32 %v991_v9, %v990_v4  ;;  %v999_v20 = vadd.f32 %v998_v10, %v997_v5  ;;  %v3034_v4 = vld [vmem:[#allocation8 + $0x3f0] sm:$0xf0]  ;;  %v3162_v9 = vld [vmem:[#allocation8 + $0xa4] sm:$0xf] }
 0x192   :  { %v971_v26 = vpop.f32.mrf.mxu2  ;;  %v984_v27 = vpop.f32.mrf.mxu3  ;;  %v3037_v8 = vor.u32 %v3266_v3, %v3034_v4  ;;  %v2618_v10 = vld [vmem:[#allocation8 + $0xb0] sm:$0xf0]  ;;  %v3254_v3 = vld [vmem:[#allocation8 + $0x384] sm:$0xf] }
 0x193   :  { %v993_v36 = vrot.slane %v992_v18, 2  ;;  %v1000_v37 = vrot.slane %v999_v20, 2  ;;  %v3566_v38 = vadd.f32 %v971_v26, %v770_v61  ;;  %v3568_v39 = vadd.f32 %v984_v27, %v771_v6  ;;  %v947_v40 = vpop.f32.mrf.mxu0  ;;  %v960_v19 = vpop.f32.mrf.mxu1  ;;  %v3240_v61 = vld [vmem:[#allocation8 + $0x30c] sm:$0xf0]  ;;  %2000 = vmatpush.bf16.msra.mxu2 %v2909_v7  ;;  %v3018_v26 = vld [vmem:[#allocation8 + $0x3d0] sm:$0xf0]  ;;  %1989 = vmatpush.bf16.msra.mxu1 %v2749_v24 }
 0x194   :  { %v2921_v1 = vor.u32 %v3240_v61, %v2920_v54  ;;  %v2621_v16 = vor.u32 %v3162_v9, %v2618_v10  ;;  %v3021_v33 = vor.u32 %v3262_v28, %v3018_v26  ;;  %v2605_v19 = vor.u32 %v3158_v34, %v2602_v35  ;;  %v2986_v4 = vld [vmem:[#allocation8 + $0x390] sm:$0xf0]  ;;  %v3250_v24 = vld [vmem:[#allocation8 + $0x364] sm:$0xf] }
 0x195   :  { %v994_v45 = vadd.f32 %v993_v36, %v992_v18  ;;  %v1001_v46 = vadd.f32 %v1000_v37, %v999_v20  ;;  %v1004_v47 = vsel %vm114_vm0, %v3566_v38, 0.0  ;;  %v1011_v48 = vsel %vm114_vm0, %v3568_v39, 0.0  ;;  %v3230_v18 = vld [vmem:[#allocation8 + $0x2c4] sm:$0xf]  ;;  %v2570_v9 = vld [vmem:[#allocation8 + $0x50] sm:$0xf0] }
 0x196   :  { %v1005_v50 = vrot.slane %v1004_v47, 4  ;;  %v1012_v51 = vrot.slane %v1011_v48, 4  ;;  %1968 = vmatpush.bf16.msrb.mxu3 %v2921_v1  ;;  %1976 = vmatpush.bf16.msra.mxu0 %v2621_v16  ;;  %v2893_v31 = vor.u32 %v3230_v18, %v2890_v25  ;;  %v3190_v36 = vld [vmem:[#allocation8 + $0x184] sm:$0xf]  ;;  %v2989_v11 = vor.u32 %v3254_v3, %v2986_v4  ;;  %v2970_v25 = vld [vmem:[#allocation8 + $0x370] sm:$0xf0] }
 0x197   :  { %v995_v55 = vrot.slane %v994_v45, 1  ;;  %v1002_v56 = vrot.slane %v1001_v46, 1  ;;  %v2733_v29 = vor.u32 %v3190_v36, %v2730_v41  ;;  %v2682_v41 = vld [vmem:[#allocation8 + $0x130] sm:$0xf0]  ;;  %v3210_v3 = vld [vmem:[#allocation8 + $0x224] sm:$0xf] }
 0x198   :  { %v1006_v63 = vadd.f32 %v1005_v50, %v1004_v47  ;;  %v1013_v0 = vadd.f32 %v1012_v51, %v1011_v48  ;;  %2001 = vmatpush.bf16.msra.mxu2 %v2893_v31  ;;  %v3258_v47 = vld [vmem:[#allocation8 + $0x3a4] sm:$0xf]  ;;  %v2586_v51 = vld [vmem:[#allocation8 + $0x70] sm:$0xf0] }
 0x199   :  { %v996_v5 = vadd.f32 %v995_v55, %v994_v45  ;;  %v1003_v6 = vadd.f32 %v1002_v56, %v1001_v46  ;;  %v3154_v50 = vld [vmem:[#allocation8 + $0x64] sm:$0xf]  ;;  %1990 = vmatpush.bf16.msra.mxu1 %v2733_v29  ;;  %v2714_v55 = vld [vmem:[#allocation8 + $0x170] sm:$0xf0] }
 0x19a   :  { %v1007_v12 = vrot.slane %v1006_v63, 2  ;;  %v1014_v13 = vrot.slane %v1013_v0, 2  ;;  %v973_v14 = vpop.f32.mrf.mxu2  ;;  %v986_v15 = vpop.f32.mrf.mxu3  ;;  %2013 = vmatpush.bf16.msra.mxu3 %v3037_v8  ;;  %1977 = vmatpush.bf16.msra.mxu0 %v2605_v19  ;;  %v2589_v54 = vor.u32 %v3154_v50, %v2586_v51  ;;  %v2717_v1 = vor.u32 %v3186_v22, %v2714_v55  ;;  %v3150_v8 = vld [vmem:[#allocation8 + $0x44] sm:$0xf] }
 0x19b   :  { %v1018_v20 = vmul.f32 %v996_v5, %v3496_v59  ;;  %v1019_v21 = vmul.f32 %v1003_v6, %v3496_v59  ;;  %v2698_v14 = vld [vmem:[#allocation8 + $0x150] sm:$0xf0]  ;;  %v3146_v31 = vld [vmem:[#allocation8 + $0x24] sm:$0xf] }
 0x19c   :  { %v1008_v27 = vadd.f32 %v1007_v12, %v1006_v63  ;;  %v1015_v30 = vadd.f32 %v1014_v13, %v1013_v0  ;;  %v3222_v63 = vld [vmem:[#allocation8 + $0x284] sm:$0xf]  ;;  %v2858_v0 = vld [vmem:[#allocation8 + $0x290] sm:$0xf0]  ;;  %v2573_v12 = vor.u32 %v3150_v8, %v2570_v9 }
 0x19d   :  { %v3577_v37 = vsub.f32 %v3556_v58, %v1018_v20  ;;  %v3580_v40 = vsub.f32 %v3558_v60, %v1019_v21  ;;  %v2877_v58 = vor.u32 %v3226_v43, %v2874_v44  ;;  %v3002_v60 = vld [vmem:[#allocation8 + $0x3b0] sm:$0xf0]  ;;  %v2861_v2 = vor.u32 %v3222_v63, %v2858_v0  ;;  %1991 = vmatpush.bf16.msra.mxu1 %v2717_v1  ;;  %v3182_v13 = vld [vmem:[#allocation8 + $0x144] sm:$0xf] }
 0x19e   :  { %v1009_v42 = vrot.slane %v1008_v27, 1  ;;  %v1016_v32 = vrot.slane %v1015_v30, 1  ;;  %2014 = vmatpush.bf16.msra.mxu3 %v3021_v33  ;;  %v3005_v49 = vor.u32 %v3258_v47, %v3002_v60  ;;  %1978 = vmatpush.bf16.msra.mxu0 %v2589_v54  ;;  %v2701_v18 = vor.u32 %v3182_v13, %v2698_v14  ;;  %v3218_v20 = vld [vmem:[#allocation8 + $0x264] sm:$0xf]  ;;  %v2554_v33 = vld [vmem:[#allocation8 + $0x30] sm:$0xf0] }
 0x19f   :  { %v1026_v45 = vmul.f32 %v3577_v37, %v3577_v37  ;;  %v1027_v46 = vmul.f32 %v3580_v40, %v3580_v40  ;;  %2002 = vmatpush.bf16.msra.mxu2 %v2877_v58  ;;  %v2557_v36 = vor.u32 %v3146_v31, %v2554_v33  ;;  %v3178_v19 = vld [vmem:[#allocation8 + $0x124] sm:$0xf]  ;;  %v2938_v9 = vld [vmem:[#allocation8 + $0x330] sm:$0xf0] }
 0x1a0   :  { %v1010_v48 = vadd.f32 %v1009_v42, %v1008_v27  ;;  %v1017_v23 = vadd.f32 %v1016_v32, %v1015_v30  ;;  %v2973_v30 = vor.u32 %v3250_v24, %v2970_v25  ;;  %v2685_v43 = vor.u32 %v3178_v19, %v2682_v41  ;;  %v3214_v44 = vld [vmem:[#allocation8 + $0x244] sm:$0xf] }
 0x1a1   :  { %v1030_v52 = vsel %vm114_vm0, %v1026_v45, 0.0  ;;  %v1037_v53 = vsel %vm114_vm0, %v1027_v46, 0.0  ;;  %1992 = vmatpush.bf16.msra.mxu1 %v2701_v18  ;;  %v2826_v46 = vld [vmem:[#allocation8 + $0x250] sm:$0xf0]  ;;  %v3246_v58 = vld [vmem:[#allocation8 + $0x344] sm:$0xf] }
 0x1a2   :  { %v1031_v56 = vrot.slane %v1030_v52, 4  ;;  %v1038_v57 = vrot.slane %v1037_v53, 4  ;;  %v1020_v61 = vmul.f32 %v1010_v48, %v3496_v59  ;;  %v1021_v62 = vmul.f32 %v1017_v23, %v3496_v59  ;;  %2015 = vmatpush.bf16.msra.mxu3 %v3005_v49  ;;  %1979 = vmatpush.bf16.msra.mxu0 %v2573_v12  ;;  %v2954_v23 = vld [vmem:[#allocation8 + $0x350] sm:$0xf0]  ;;  %v3142_v49 = vld [vmem:[#allocation8 + $0x4] sm:$0xf] }
 0x1a3   :  { %2003 = vmatpush.bf16.msra.mxu2 %v2861_v2  ;;  %v2829_v51 = vor.u32 %v3214_v44, %v2826_v46  ;;  %v2957_v22 = vor.u32 %v3246_v58, %v2954_v23  ;;  %v3614_v44 = vld [vmem:[%s3669_s10] sm:$0xf] }
 0x1a4   :  { %v1032_v5 = vadd.f32 %v1031_v56, %v1030_v52  ;;  %v1039_v6 = vadd.f32 %v1038_v57, %v1037_v53  ;;  %v3591_v7 = vsub.f32 %v3566_v38, %v1020_v61  ;;  %v3594_v10 = vsub.f32 %v3568_v39, %v1021_v62  ;;  %v2842_v38 = vld [vmem:[#allocation8 + $0x270] sm:$0xf0]  ;;  %v3174_v53 = vld [vmem:[#allocation8 + $0x104] sm:$0xf] }
 0x1a5   :  { %v2845_v39 = vor.u32 %v3218_v20, %v2842_v38  ;;  %1993 = vmatpush.bf16.msra.mxu1 %v2685_v43  ;;  %v2538_v52 = vld [vmem:[#allocation8 + $0x10] sm:$0xf0] }
 0x1a6   :  { %v1033_v15 = vrot.slane %v1032_v5, 2  ;;  %v1040_v16 = vrot.slane %v1039_v6, 2  ;;  %v1028_v17 = vmul.f32 %v3591_v7, %v3591_v7  ;;  %v1029_v21 = vmul.f32 %v3594_v10, %v3594_v10  ;;  %2016 = vmatpush.bf16.msra.mxu3 %v2989_v11  ;;  %1980 = vmatpush.bf16.msra.mxu0 %v2557_v36  ;;  %v2666_v61 = vld [vmem:[#allocation8 + $0x110] sm:$0xf0] }
 0x1a7   :  { %2004 = vmatpush.bf16.msra.mxu2 %v2845_v39  ;;  %v2541_v57 = vor.u32 %v3142_v49, %v2538_v52  ;;  %v2669_v63 = vor.u32 %v3174_v53, %v2666_v61  ;;  %v2922_v38 = vld [vmem:[#allocation8 + $0x310] sm:$0xf0]  ;;  %v1125_v53 = vperm.slane %v3614_v44, 1  ;;  %v2656_v61 = vld [vmem:[#allocation8 + $0xe8] sm:$0xf] }
 0x1a8   :  { %v1034_v28 = vadd.f32 %v1033_v15, %v1032_v5  ;;  %v1041_v26 = vadd.f32 %v1040_v16, %v1039_v6  ;;  %v1044_v27 = vsel %vm114_vm0, %v1028_v17, 0.0  ;;  %v1051_v35 = vsel %vm114_vm0, %v1029_v21, 0.0  ;;  %v2810_v5 = vld [vmem:[#allocation8 + $0x230] sm:$0xf0]  ;;  %v3242_v6 = vld [vmem:[#allocation8 + $0x324] sm:$0xf] }
 0x1a9   :  { %v1045_v34 = vrot.slane %v1044_v27, 4  ;;  %v1052_v29 = vrot.slane %v1051_v35, 4  ;;  %1994 = vmatpush.bf16.msra.mxu1 %v2669_v63  ;;  %v2813_v12 = vor.u32 %v3210_v3, %v2810_v5  ;;  %v2941_v13 = vor.u32 %v3242_v6, %v2938_v9  ;;  %v3206_v15 = vld [vmem:[#allocation8 + $0x204] sm:$0xf]  ;;  %v2794_v16 = vld [vmem:[#allocation8 + $0x210] sm:$0xf0] }
 0x1aa   :  { %v1035_v42 = vrot.slane %v1034_v28, 1  ;;  %v1042_v32 = vrot.slane %v1041_v26, 1  ;;  %2017 = vmatpush.bf16.msra.mxu3 %v2973_v30  ;;  %1981 = vmatpush.bf16.msra.mxu0 %v2541_v57  ;;  %v3238_v17 = vld [vmem:[#allocation8 + $0x304] sm:$0xf]  ;;  %v2797_v20 = vor.u32 %v3206_v15, %v2794_v16  ;;  %v3205_v3 = vld [vmem:[#allocation8 + $0x1f4] sm:$0xf0] }
 0x1ab   :  { %v1046_v45 = vadd.f32 %v1045_v34, %v1044_v27  ;;  %v1053_v48 = vadd.f32 %v1052_v29, %v1051_v35  ;;  %2005 = vmatpush.bf16.msra.mxu2 %v2829_v51  ;;  %v2925_v39 = vor.u32 %v3238_v17, %v2922_v38  ;;  %v1124_v51 = vperm.slane %v3614_v44, 0  ;;  %v2640_v17 = vld [vmem:[#allocation8 + $0xc8] sm:$0xf] }
 0x1ac   :  { %v1036_v47 = vadd.f32 %v1035_v42, %v1034_v28  ;;  %v1043_v60 = vadd.f32 %v1042_v32, %v1041_v26 }
 0x1ad   :  { %v1047_v50 = vrot.slane %v1046_v45, 2  ;;  %v1054_v56 = vrot.slane %v1053_v48, 2 }
 0x1ae   :  { %v1058_v54 = vmul.f32 %v1036_v47, %v3496_v59  ;;  %v1059_v55 = vmul.f32 %v1043_v60, %v3496_v59  ;;  %2018 = vmatpush.bf16.msra.mxu3 %v2957_v22 }
 0x1af   :  { %v1048_v62 = vadd.f32 %v1047_v50, %v1046_v45  ;;  %v1055_v2 = vadd.f32 %v1054_v56, %v1053_v48  ;;  %2006 = vmatpush.bf16.msra.mxu2 %v2813_v12 }
 0x1b0   :  { %v1062_v0 = vadd.f32 1e-05, %v1058_v54  ;;  %v1063_v1 = vadd.f32 1e-05, %v1059_v55 }
 0x1b1   :  { %v1049_v4 = vrot.slane %v1048_v62, 1  ;;  %v1056_v8 = vrot.slane %v1055_v2, 1 }
 0x1b2   :  { %3290 = vrsqrt.f32 %v1062_v0  ;;  %2019 = vmatpush.bf16.msra.mxu3 %v2941_v13  ;;  %vm1072_vm12 = vweird.f32 %v1062_v0  ;;  %vm1082_vm14 = vweird.f32 %v1063_v1  ;;  %v1126_v13 = vperm.slane %v3614_v44, 2 }
 0x1b3   :  { %3292 = vrsqrt.f32 %v1063_v1  ;;  %v1050_v11 = vadd.f32 %v1049_v4, %v1048_v62  ;;  %v1057_v14 = vadd.f32 %v1056_v8, %v1055_v2  ;;  %2007 = vmatpush.bf16.msra.mxu2 %v2797_v20  ;;  %v3173_v62 = vld [vmem:[#allocation8 + $0xf4] sm:$0xf0]  ;;  %v2784_v2 = vld [vmem:[#allocation8 + $0x1e8] sm:$0xf]  ;;  %v1127_v20 = vperm.slane %v3614_v44, 3 }
 0x1b4   :  { %v2657_v8 = vor.u32 %v3173_v62, %v2656_v61  ;;  %v2785_v16 = vor.u32 %v3205_v3, %v2784_v2  ;;  %v2896_v44 = vld [vmem:[#allocation8 + $0x2c8] sm:$0xf]  ;;  %v3157_v62 = vld [vmem:[#allocation8 + $0x74] sm:$0xf0] }
 0x1b5   :  { %v1060_v18 = vmul.f32 %v1050_v11, %v3496_v59  ;;  %v1061_v21 = vmul.f32 %v1057_v14, %v3496_v59  ;;  %v3609_v59 = vld [vmem:[%s3668_s9] sm:$0xf]  ;;  %v2592_v61 = vld [vmem:[#allocation8 + $0x68] sm:$0xf] }
 0x1b6   :  { %2020 = vmatpush.bf16.msra.mxu3 %v2925_v39  ;;  %v1111_v45 = vperm.slane %v3609_v59, 0  ;;  %v1112_v60 = vperm.slane %v3609_v59, 1  ;;  %v1114_v5 = vperm.slane %v3609_v59, 3  ;;  %v2768_v39 = vld [vmem:[#allocation8 + $0x1c8] sm:$0xf]  ;;  %v2593_v3 = vor.u32 %v3157_v62, %v2592_v61 }
 0x1b7   :  { %v1064_v24 = vadd.f32 1e-05, %v1060_v18  ;;  %v1065_v28 = vadd.f32 1e-05, %v1061_v21  ;;  %v3169_v18 = vld [vmem:[#allocation8 + $0xd4] sm:$0xf0] }
 0x1b8   :  { %v3291_v25 = vpop.eup %3290  ;;  %v3225_v2 = vld [vmem:[#allocation8 + $0x294] sm:$0xf0]  ;;  %v2800_v61 = vld [vmem:[#allocation8 + $0x208] sm:$0xf] }
 0x1b9   :  { %v3293_v26 = vpop.eup %3292  ;;  %v1067_v27 = vmul.f32 %v3291_v25, %v1062_v0  ;;  %3294 = vrsqrt.f32 %v1064_v24  ;;  %vm1073_vm10 = vweird.f32 %v3291_v25  ;;  %vm1092_vm3 = vweird.f32 %v1064_v24  ;;  %v3209_v62 = vld [vmem:[#allocation8 + $0x214] sm:$0xf0] }
 0x1ba   :  { %v1077_v30 = vmul.f32 %v3293_v26, %v1063_v1  ;;  %3296 = vrsqrt.f32 %v1065_v28  ;;  %vm1083_vm11 = vweird.f32 %v3293_v26  ;;  %vm1074_vm13 = vmor %vm1072_vm12, %vm1073_vm10  ;;  %v1113_v0 = vperm.slane %v3609_v59, 2  ;;  %v2752_v59 = vld [vmem:[#allocation8 + $0x1a8] sm:$0xf] }
 0x1bb   :  { %v1068_v31 = vmul.f32 %v3291_v25, %v1067_v27  ;;  %vm1084_vm15 = vmor %vm1082_vm14, %vm1083_vm11  ;;  %vm1102_vm5 = vweird.f32 %v1065_v28  ;;  %v3040_v27 = vld [vmem:[#allocation8 + $0x3e8] sm:$0xf] }
 0x1bc   :  { %v1078_v33 = vmul.f32 %v3293_v26, %v1077_v30 }
 0x1bd   :  { %v1069_v34 = vmul.f32 0.5, %v1068_v31 }
 0x1be   :  { %v1079_v35 = vmul.f32 0.5, %v1078_v33  ;;  %v3269_v33 = vld [vmem:[#allocation8 + $0x3f4] sm:$0xf0] }
 0x1bf   :  { %v3295_v36 = vpop.eup %3294  ;;  %v1070_v19 = vsub.f32 1.5, %v1069_v34  ;;  %v2624_v34 = vld [vmem:[#allocation8 + $0xa8] sm:$0xf] }
 0x1c0   :  { %v3297_v41 = vpop.eup %3296  ;;  %v1080_v42 = vsub.f32 1.5, %v1079_v35  ;;  %v1087_v32 = vmul.f32 %v3295_v36, %v1064_v24  ;;  %vm1093_vm1 = vweird.f32 %v3295_v36  ;;  %v3201_v24 = vld [vmem:[#allocation8 + $0x1d4] sm:$0xf0] }
 0x1c1   :  { %v1071_v29 = vmul.f32 %v3291_v25, %v1070_v19  ;;  %v1097_v43 = vmul.f32 %v3297_v41, %v1065_v28  ;;  %vm1103_vm2 = vweird.f32 %v3297_v41  ;;  %vm1094_vm4 = vmor %vm1092_vm3, %vm1093_vm1  ;;  %v2912_v28 = vld [vmem:[#allocation8 + $0x2e8] sm:$0xf]  ;;  %v2769_v30 = vor.u32 %v3201_v24, %v2768_v39  ;;  %v3165_v35 = vld [vmem:[#allocation8 + $0xb4] sm:$0xf0] }
 0x1c2   :  { %v1081_v46 = vmul.f32 %v3293_v26, %v1080_v42  ;;  %v1088_v58 = vmul.f32 %v3295_v36, %v1087_v32  ;;  %vm1104_vm6 = vmor %vm1102_vm5, %vm1103_vm2  ;;  %v3197_v19 = vld [vmem:[#allocation8 + $0x1b4] sm:$0xf0]  ;;  %v2560_v24 = vld [vmem:[#allocation8 + $0x28] sm:$0xf] }
 0x1c3   :  { %v1075_v47 = vsel %vm1074_vm13, %v3291_v25, %v1071_v29  ;;  %v1098_v48 = vmul.f32 %v3297_v41, %v1097_v43  ;;  %v3041_v29 = vor.u32 %v3269_v33, %v3040_v27  ;;  %v2625_v43 = vor.u32 %v3165_v35, %v2624_v34  ;;  %v3253_v39 = vld [vmem:[#allocation8 + $0x374] sm:$0xf0]  ;;  %v2832_v27 = vld [vmem:[#allocation8 + $0x248] sm:$0xf] }
 0x1c4   :  { %v1106_v23 = vmul.f32 %v1075_v47, %v3577_v37  ;;  %v1085_v49 = vsel %vm1084_vm15, %v3293_v26, %v1081_v46  ;;  %v1089_v50 = vmul.f32 0.5, %v1088_v58  ;;  %v3237_v26 = vld [vmem:[#allocation8 + $0x2f4] sm:$0xf0]  ;;  %v3024_v46 = vld [vmem:[#allocation8 + $0x3c8] sm:$0xf]  ;;  %v2753_v47 = vor.u32 %v3197_v19, %v2752_v59 }
 0x1c5   :  { %v1107_v22 = vmul.f32 %v1085_v49, %v3580_v40  ;;  %v1099_v52 = vmul.f32 0.5, %v1098_v48  ;;  %v2913_v42 = vor.u32 %v3237_v26, %v2912_v28  ;;  %v2608_v48 = vld [vmem:[#allocation8 + $0x88] sm:$0xf]  ;;  %v3249_v35 = vld [vmem:[#allocation8 + $0x354] sm:$0xf0] }
 0x1c6   :  { %v1119_v54 = vmul.f32 %v1111_v45, %v1106_v23  ;;  %v1090_v55 = vsub.f32 1.5, %v1089_v50  ;;  %v3233_v45 = vld [vmem:[#allocation8 + $0x2d4] sm:$0xf0]  ;;  %v2736_v49 = vld [vmem:[#allocation8 + $0x188] sm:$0xf] }
 0x1c7   :  { %v1120_v56 = vmul.f32 %v1112_v60, %v1107_v22  ;;  %v1100_v57 = vsub.f32 1.5, %v1099_v52  ;;  %v3265_v60 = vld [vmem:[#allocation8 + $0x3d4] sm:$0xf0]  ;;  %v2672_v19 = vld [vmem:[#allocation8 + $0x108] sm:$0xf] }
 0x1c8   :  { %v1091_v63 = vmul.f32 %v3295_v36, %v1090_v55  ;;  %v1132_v37 = vadd.f32 %v1124_v51, %v1119_v54  ;;  %v3161_v23 = vld [vmem:[#allocation8 + $0x94] sm:$0xf0]  ;;  %v2897_v51 = vor.u32 %v3233_v45, %v2896_v44  ;;  %v3025_v22 = vor.u32 %v3265_v60, %v3024_v46  ;;  %v3203_v44 = vld [vmem:[#allocation8 + $0x1ec] sm:$0xf]  ;;  %v2786_v45 = vld [vmem:[#allocation8 + $0x1f8] sm:$0xf0] }
 0x1c9   :  { %v1101_v1 = vmul.f32 %v3297_v41, %v1100_v57  ;;  %v1133_v40 = vadd.f32 %v1125_v53, %v1120_v56  ;;  %v3193_v50 = vld [vmem:[#allocation8 + $0x194] sm:$0xf0]  ;;  %v2609_v52 = vor.u32 %v3161_v23, %v2608_v48  ;;  %v2880_v53 = vld [vmem:[#allocation8 + $0x2a8] sm:$0xf] }
 0x1ca   :  { %v1095_v4 = vsel %vm1094_vm4, %v3295_v36, %v1091_v63  ;;  %v1136_v6 = vmax.f32 %v1132_v37, 0.0  ;;  %v3229_v54 = vld [vmem:[#allocation8 + $0x2b4] sm:$0xf0]  ;;  %v2737_v55 = vor.u32 %v3193_v50, %v2736_v49  ;;  %v3008_v56 = vld [vmem:[#allocation8 + $0x3a8] sm:$0xf] }
 0x1cb   :  { %v1108_v9 = vmul.f32 %v1095_v4, %v3591_v7  ;;  %v1105_v11 = vsel %vm1104_vm6, %v3297_v41, %v1101_v1  ;;  %v1137_v12 = vmax.f32 %v1133_v40, 0.0  ;;  %v2641_v7 = vor.u32 %v3169_v18, %v2640_v17  ;;  %v3261_v57 = vld [vmem:[#allocation8 + $0x3b4] sm:$0xf0]  ;;  %v2720_v63 = vld [vmem:[#allocation8 + $0x168] sm:$0xf] }
 0x1cc   :  { %v1109_v14 = vmul.f32 %v1105_v11, %v3594_v10  ;;  %v3627_v15 = vpack.c.bf16 %v1136_v6, %v1136_v6  ;;  %v3189_v37 = vld [vmem:[#allocation8 + $0x174] sm:$0xf0]  ;;  %v3009_v1 = vor.u32 %v3261_v57, %v3008_v56  ;;  %v2864_v40 = vld [vmem:[#allocation8 + $0x288] sm:$0xf]  ;;  %v2770_v56 = vld [vmem:[#allocation8 + $0x1d8] sm:$0xf0] }
 0x1cd   :  { %v1121_v38 = vmul.f32 %v1113_v0, %v1108_v9  ;;  %v3630_v21 = vpack.c.bf16 %v1137_v12, %v1137_v12  ;;  %v2881_v0 = vor.u32 %v3229_v54, %v2880_v53  ;;  %v2721_v4 = vor.u32 %v3189_v37, %v2720_v63  ;;  %v3257_v6 = vld [vmem:[#allocation8 + $0x394] sm:$0xf0]  ;;  %v2704_v11 = vld [vmem:[#allocation8 + $0x148] sm:$0xf]  ;;  %v2642_v54 = vld [vmem:[#allocation8 + $0xd8] sm:$0xf0] }
 0x1ce   :  { %v1122_v25 = vmul.f32 %v1114_v5, %v1109_v14  ;;  %1930 = vmatmul.bf16.vlgmr.msrb.gmra.mxu0 %v3627_v15  ;;  %v2992_v5 = vld [vmem:[#allocation8 + $0x388] sm:$0xf]  ;;  %v3153_v9 = vld [vmem:[#allocation8 + $0x54] sm:$0xf0] }
 0x1cf   :  { %1943 = vmatmul.bf16.vlgmr.msrb.gmra.mxu1 %v3630_v21  ;;  %2026 = vmatpush.bf16.msrb.mxu0 %v2657_v8  ;;  %v1134_v10 = vadd.f32 %v1126_v13, %v1121_v38  ;;  %v2576_v8 = vld [vmem:[#allocation8 + $0x48] sm:$0xf]  ;;  %v3185_v12 = vld [vmem:[#allocation8 + $0x154] sm:$0xf0]  ;;  %v2865_v13 = vor.u32 %v3225_v2, %v2864_v40  ;;  %v2993_v14 = vor.u32 %v3257_v6, %v2992_v5  ;;  %v3163_v5 = vld [vmem:[#allocation8 + $0xac] sm:$0xf] }
 0x1d0   :  { %2039 = vmatpush.bf16.msrb.mxu1 %v2785_v16  ;;  %v1135_v31 = vadd.f32 %v1127_v20, %v1122_v25  ;;  %v2848_v16 = vld [vmem:[#allocation8 + $0x268] sm:$0xf]  ;;  %v3221_v17 = vld [vmem:[#allocation8 + $0x274] sm:$0xf0]  ;;  %v2577_v18 = vor.u32 %v3153_v9, %v2576_v8  ;;  %v2705_v20 = vor.u32 %v3185_v12, %v2704_v11  ;;  %v2801_v6 = vor.u32 %v3209_v62, %v2800_v61  ;;  %v2626_v8 = vld [vmem:[#allocation8 + $0xb8] sm:$0xf0] }
 0x1d1   :  { %v1138_v36 = vmax.f32 %v1134_v10, 0.0  ;;  %v2976_v38 = vld [vmem:[#allocation8 + $0x368] sm:$0xf]  ;;  %v3149_v25 = vld [vmem:[#allocation8 + $0x34] sm:$0xf0]  ;;  %v2849_v28 = vor.u32 %v3221_v17, %v2848_v16 }
 0x1d2   :  { %v1139_v41 = vmax.f32 %v1135_v31, 0.0  ;;  %v3181_v10 = vld [vmem:[#allocation8 + $0x134] sm:$0xf0]  ;;  %v2977_v26 = vor.u32 %v3253_v39, %v2976_v38  ;;  %v2960_v31 = vld [vmem:[#allocation8 + $0x348] sm:$0xf]  ;;  %v2561_v33 = vor.u32 %v3149_v25, %v2560_v24 }
 0x1d3   :  { %2027 = vmatpush.bf16.msrb.mxu0 %v2641_v7  ;;  %v3634_v32 = vpack.c.bf16 %v1138_v36, %v1138_v36  ;;  %v2688_v7 = vld [vmem:[#allocation8 + $0x128] sm:$0xf]  ;;  %v3145_v59 = vld [vmem:[#allocation8 + $0x14] sm:$0xf0]  ;;  %v2961_v46 = vor.u32 %v3249_v35, %v2960_v31  ;;  %v3195_v9 = vld [vmem:[#allocation8 + $0x1ac] sm:$0xf] }
 0x1d4   :  { %2040 = vmatpush.bf16.msrb.mxu1 %v2769_v30  ;;  %v3636_v58 = vpack.c.bf16 %v1139_v41, %v1139_v41  ;;  %v3217_v30 = vld [vmem:[#allocation8 + $0x254] sm:$0xf0]  ;;  %v2689_v34 = vor.u32 %v3181_v10, %v2688_v7  ;;  %v2544_v36 = vld [vmem:[#allocation8 + $0x8] sm:$0xf]  ;;  %v2754_v11 = vld [vmem:[#allocation8 + $0x1b8] sm:$0xf0] }
 0x1d5   :  { %1956 = vmatmul.bf16.vlgmr.msrb.gmra.mxu2 %v3634_v32  ;;  %v3177_v41 = vld [vmem:[#allocation8 + $0x114] sm:$0xf0]  ;;  %v2545_v48 = vor.u32 %v3145_v59, %v2544_v36  ;;  %v2944_v49 = vld [vmem:[#allocation8 + $0x328] sm:$0xf]  ;;  %v3231_v16 = vld [vmem:[#allocation8 + $0x2cc] sm:$0xf] }
 0x1d6   :  { %1969 = vmatmul.bf16.vlgmr.msrb.gmra.mxu3 %v3636_v58  ;;  %2052 = vmatpush.bf16.msrb.mxu2 %v2913_v42  ;;  %v3171_v42 = vld [vmem:[#allocation8 + $0xec] sm:$0xf]  ;;  %v3213_v60 = vld [vmem:[#allocation8 + $0x234] sm:$0xf0]  ;;  %v2673_v23 = vor.u32 %v3177_v41, %v2672_v19  ;;  %v2928_v63 = vld [vmem:[#allocation8 + $0x308] sm:$0xf] }
 0x1d7   :  { %2065 = vmatpush.bf16.msrb.mxu3 %v3041_v29  ;;  %2028 = vmatpush.bf16.msrb.mxu0 %v2625_v43  ;;  %v2833_v29 = vor.u32 %v3217_v30, %v2832_v27  ;;  %v2658_v43 = vld [vmem:[#allocation8 + $0xf8] sm:$0xf0]  ;;  %v3245_v50 = vld [vmem:[#allocation8 + $0x334] sm:$0xf0]  ;;  %v3263_v38 = vld [vmem:[#allocation8 + $0x3cc] sm:$0xf] }
 0x1d8   :  { %2041 = vmatpush.bf16.msrb.mxu1 %v2753_v47  ;;  %v2816_v47 = vld [vmem:[#allocation8 + $0x228] sm:$0xf]  ;;  %v2945_v57 = vor.u32 %v3245_v50, %v2944_v49  ;;  %v3241_v37 = vld [vmem:[#allocation8 + $0x314] sm:$0xf0]  ;;  %v2898_v17 = vld [vmem:[#allocation8 + $0x2d8] sm:$0xf0] }
 0x1d9   :  { %v2817_v53 = vor.u32 %v3213_v60, %v2816_v47  ;;  %v2929_v12 = vor.u32 %v3241_v37, %v2928_v63  ;;  %v3026_v39 = vld [vmem:[#allocation8 + $0x3d8] sm:$0xf0]  ;;  %v3159_v24 = vld [vmem:[#allocation8 + $0x8c] sm:$0xf] }
 0x1da   :  { %2053 = vmatpush.bf16.msrb.mxu2 %v2897_v51  ;;  %v2661_v51 = vor.u32 %v3171_v42, %v2658_v43  ;;  %v2610_v25 = vld [vmem:[#allocation8 + $0x98] sm:$0xf0]  ;;  %v3191_v7 = vld [vmem:[#allocation8 + $0x18c] sm:$0xf] }
 0x1db   :  { %2066 = vmatpush.bf16.msrb.mxu3 %v3025_v22  ;;  %2029 = vmatpush.bf16.msrb.mxu0 %v2609_v52  ;;  %v2789_v22 = vor.u32 %v3203_v44, %v2786_v45  ;;  %v3167_v52 = vld [vmem:[#allocation8 + $0xcc] sm:$0xf]  ;;  %v2738_v10 = vld [vmem:[#allocation8 + $0x198] sm:$0xf0]  ;;  %v2613_v31 = vor.u32 %v3159_v24, %v2610_v25 }
 0x1dc   :  { %2042 = vmatpush.bf16.msrb.mxu1 %v2737_v55  ;;  %v3199_v55 = vld [vmem:[#allocation8 + $0x1cc] sm:$0xf]  ;;  %v2645_v40 = vor.u32 %v3167_v52, %v2642_v54  ;;  %v2882_v30 = vld [vmem:[#allocation8 + $0x2b8] sm:$0xf0] }
 0x1dd   :  { %v2773_v2 = vor.u32 %v3199_v55, %v2770_v56  ;;  %v3227_v27 = vld [vmem:[#allocation8 + $0x2ac] sm:$0xf]  ;;  %v3010_v35 = vld [vmem:[#allocation8 + $0x3b8] sm:$0xf0] }
 0x1de   :  { %2054 = vmatpush.bf16.msrb.mxu2 %v2881_v0  ;;  %1982 = vmatmul.bf16.vlgmr.msra.gmra.mxu0 %v3627_v15  ;;  %v3235_v0 = vld [vmem:[#allocation8 + $0x2ec] sm:$0xf]  ;;  %v2594_v59 = vld [vmem:[#allocation8 + $0x78] sm:$0xf0]  ;;  %v2885_v42 = vor.u32 %v3227_v27, %v2882_v30 }
 0x1df   :  { %2067 = vmatpush.bf16.msrb.mxu3 %v3009_v1  ;;  %1995 = vmatmul.bf16.vlgmr.msra.gmra.mxu1 %v3630_v21  ;;  %v2914_v1 = vld [vmem:[#allocation8 + $0x2f8] sm:$0xf0]  ;;  %v3155_v36 = vld [vmem:[#allocation8 + $0x6c] sm:$0xf] }
 0x1e0   :  { %2030 = vmatpush.bf16.msrb.mxu0 %v2593_v3  ;;  %2043 = vmatpush.bf16.msrb.mxu1 %v2721_v4  ;;  %v3267_v3 = vld [vmem:[#allocation8 + $0x3ec] sm:$0xf]  ;;  %v3042_v4 = vld [vmem:[#allocation8 + $0x3f8] sm:$0xf0]  ;;  %v2597_v45 = vor.u32 %v3155_v36, %v2594_v59 }
 0x1e1   :  { %v3187_v19 = vld [vmem:[#allocation8 + $0x16c] sm:$0xf]  ;;  %v2722_v41 = vld [vmem:[#allocation8 + $0x178] sm:$0xf0] }
 0x1e2   :  { %2055 = vmatpush.bf16.msrb.mxu2 %v2865_v13  ;;  %v2917_v13 = vor.u32 %v3235_v0, %v2914_v1  ;;  %v3223_v43 = vld [vmem:[#allocation8 + $0x28c] sm:$0xf]  ;;  %v2866_v44 = vld [vmem:[#allocation8 + $0x298] sm:$0xf0] }
 0x1e3   :  { %2068 = vmatpush.bf16.msrb.mxu3 %v2993_v14  ;;  %v3045_v14 = vor.u32 %v3267_v3, %v3042_v4  ;;  %v3255_v47 = vld [vmem:[#allocation8 + $0x38c] sm:$0xf]  ;;  %v2994_v60 = vld [vmem:[#allocation8 + $0x398] sm:$0xf0] }
 0x1e4   :  { %2031 = vmatpush.bf16.msrb.mxu0 %v2577_v18  ;;  %2044 = vmatpush.bf16.msrb.mxu1 %v2705_v20  ;;  %v2629_v18 = vor.u32 %v3163_v5, %v2626_v8  ;;  %v2757_v20 = vor.u32 %v3195_v9, %v2754_v11  ;;  %v3183_v49 = vld [vmem:[#allocation8 + $0x14c] sm:$0xf]  ;;  %v2706_v50 = vld [vmem:[#allocation8 + $0x158] sm:$0xf0] }
 0x1e5   :  { %2008 = vmatmul.bf16.vlgmr.msra.gmra.mxu2 %v3634_v32  ;;  %v3219_v52 = vld [vmem:[#allocation8 + $0x26c] sm:$0xf]  ;;  %v2709_v55 = vor.u32 %v3183_v49, %v2706_v50  ;;  %v2562_v62 = vld [vmem:[#allocation8 + $0x38] sm:$0xf0] }
 0x1e6   :  { %2021 = vmatmul.bf16.vlgmr.msra.gmra.mxu3 %v3636_v58  ;;  %2056 = vmatpush.bf16.msrb.mxu2 %v2849_v28  ;;  %v2901_v28 = vor.u32 %v3231_v16, %v2898_v17  ;;  %v3251_v56 = vld [vmem:[#allocation8 + $0x36c] sm:$0xf]  ;;  %v2690_v37 = vld [vmem:[#allocation8 + $0x138] sm:$0xf0] }
 0x1e7   :  { %2069 = vmatpush.bf16.msrb.mxu3 %v2977_v26  ;;  %v3029_v26 = vor.u32 %v3263_v38, %v3026_v39  ;;  %v3147_v61 = vld [vmem:[#allocation8 + $0x2c] sm:$0xf]  ;;  %v2546_v9 = vld [vmem:[#allocation8 + $0x18] sm:$0xf0] }
 0x1e8   :  { %2032 = vmatpush.bf16.msrb.mxu0 %v2561_v33  ;;  %2045 = vmatpush.bf16.msrb.mxu1 %v2689_v34  ;;  %v2741_v33 = vor.u32 %v3191_v7, %v2738_v10  ;;  %v3259_v34 = vld [vmem:[#allocation8 + $0x3ac] sm:$0xf]  ;;  %v2565_v3 = vor.u32 %v3147_v61, %v2562_v62  ;;  %v2818_v17 = vld [vmem:[#allocation8 + $0x238] sm:$0xf0] }
 0x1e9   :  { %v3179_v63 = vld [vmem:[#allocation8 + $0x12c] sm:$0xf]  ;;  %v2946_v39 = vld [vmem:[#allocation8 + $0x338] sm:$0xf0] }
 0x1ea   :  { %2057 = vmatpush.bf16.msrb.mxu2 %v2833_v29  ;;  %v3013_v29 = vor.u32 %v3259_v34, %v3010_v35  ;;  %v2693_v4 = vor.u32 %v3179_v63, %v2690_v37  ;;  %v3247_v5 = vld [vmem:[#allocation8 + $0x34c] sm:$0xf]  ;;  %v2802_v10 = vld [vmem:[#allocation8 + $0x218] sm:$0xf0] }
 0x1eb   :  { %2070 = vmatpush.bf16.msrb.mxu3 %v2961_v46  ;;  %v2725_v46 = vor.u32 %v3187_v19, %v2722_v41  ;;  %v3143_v8 = vld [vmem:[#allocation8 + $0xc] sm:$0xf] }
 0x1ec   :  { %2033 = vmatpush.bf16.msrb.mxu0 %v2545_v48  ;;  %2046 = vmatpush.bf16.msrb.mxu1 %v2673_v23  ;;  %v3151_v48 = vld [vmem:[#allocation8 + $0x4c] sm:$0xf]  ;;  %v2578_v23 = vld [vmem:[#allocation8 + $0x58] sm:$0xf0] }
 0x1ed   :  { %v2581_v54 = vor.u32 %v3151_v48, %v2578_v23  ;;  %v3175_v11 = vld [vmem:[#allocation8 + $0x10c] sm:$0xf] }
 0x1ee   :  { %2058 = vmatpush.bf16.msrb.mxu2 %v2817_v53  ;;  %v2850_v53 = vld [vmem:[#allocation8 + $0x278] sm:$0xf0]  ;;  %v3211_v16 = vld [vmem:[#allocation8 + $0x22c] sm:$0xf] }
 0x1ef   :  { %2071 = vmatpush.bf16.msrb.mxu3 %v2945_v57  ;;  %2034 = vmatmul.bf16.vlgmr.msrb.gmra.mxu0 %v3627_v15  ;;  %v2978_v57 = vld [vmem:[#allocation8 + $0x378] sm:$0xf0]  ;;  %v2853_v0 = vor.u32 %v3219_v52, %v2850_v53  ;;  %v3243_v38 = vld [vmem:[#allocation8 + $0x32c] sm:$0xf]  ;;  %v2821_v24 = vor.u32 %v3211_v16, %v2818_v17 }
 0x1f0   :  { %2078 = vmatpush.bf16.msra.mxu0 %v2661_v51  ;;  %2091 = vmatpush.bf16.msra.mxu1 %v2789_v22  ;;  %v2869_v51 = vor.u32 %v3223_v43, %v2866_v44  ;;  %v2997_v22 = vor.u32 %v3255_v47, %v2994_v60  ;;  %v2981_v1 = vor.u32 %v3251_v56, %v2978_v57  ;;  %v3207_v7 = vld [vmem:[#allocation8 + $0x20c] sm:$0xf] }
 0x1f1   :  { %2047 = vmatmul.bf16.vlgmr.msrb.gmra.mxu1 %v3630_v21  ;;  %v2949_v25 = vor.u32 %v3243_v38, %v2946_v39  ;;  %v2805_v27 = vor.u32 %v3207_v7, %v2802_v10 }
 0x1f2   :  { %2059 = vmatpush.bf16.msrb.mxu2 %v2801_v6  ;;  %v2962_v6 = vld [vmem:[#allocation8 + $0x358] sm:$0xf0] }
 0x1f3   :  { %2072 = vmatpush.bf16.msrb.mxu3 %v2929_v12  ;;  %v2674_v12 = vld [vmem:[#allocation8 + $0x118] sm:$0xf0] }
 0x1f4   :  { %2079 = vmatpush.bf16.msra.mxu0 %v2645_v40  ;;  %2092 = vmatpush.bf16.msra.mxu1 %v2773_v2  ;;  %v3215_v40 = vld [vmem:[#allocation8 + $0x24c] sm:$0xf]  ;;  %v2834_v2 = vld [vmem:[#allocation8 + $0x258] sm:$0xf0] }
 0x1f5   :  { %2060 = vmatmul.bf16.vlgmr.msrb.gmra.mxu2 %v3634_v32 }
 0x1f6   :  { %2104 = vmatpush.bf16.msra.mxu2 %v2917_v13  ;;  %2073 = vmatmul.bf16.vlgmr.msrb.gmra.mxu3 %v3636_v58  ;;  %v2837_v13 = vor.u32 %v3215_v40, %v2834_v2 }
 0x1f7   :  { %2117 = vmatpush.bf16.msra.mxu3 %v3045_v14  ;;  %v2965_v14 = vor.u32 %v3247_v5, %v2962_v6 }
 0x1f8   :  { %2080 = vmatpush.bf16.msra.mxu0 %v2629_v18  ;;  %2093 = vmatpush.bf16.msra.mxu1 %v2757_v20  ;;  %v2549_v18 = vor.u32 %v3143_v8, %v2546_v9  ;;  %v2677_v20 = vor.u32 %v3175_v11, %v2674_v12 }
 0x1fa   :  { %2105 = vmatpush.bf16.msra.mxu2 %v2901_v28  ;;  %v3239_v28 = vld [vmem:[#allocation8 + $0x30c] sm:$0xf] }
 0x1fb   :  { %2118 = vmatpush.bf16.msra.mxu3 %v3029_v26  ;;  %v2930_v26 = vld [vmem:[#allocation8 + $0x318] sm:$0xf0] }
 0x1fc   :  { %2081 = vmatpush.bf16.msra.mxu0 %v2613_v31  ;;  %2094 = vmatpush.bf16.msra.mxu1 %v2741_v33  ;;  %v2933_v30 = vor.u32 %v3239_v28, %v2930_v26  ;;  %v1272_v31 = vld [vmem:[%s3671_s12] sm:$0xf] }
 0x1fd   :  { %v1274_v33 = vperm.slane %v1272_v31, 0  ;;  %v1275_v56 = vperm.slane %v1272_v31, 1  ;;  %v1276_v57 = vperm.slane %v1272_v31, 2 }
 0x1fe   :  { %2106 = vmatpush.bf16.msra.mxu2 %v2885_v42 }
 0x1ff   :  { %2119 = vmatpush.bf16.msra.mxu3 %v3013_v29 }
 0x200   :  { %2082 = vmatpush.bf16.msra.mxu0 %v2597_v45  ;;  %2095 = vmatpush.bf16.msra.mxu1 %v2725_v46 }
 0x202   :  { %2107 = vmatpush.bf16.msra.mxu2 %v2869_v51 }
 0x203   :  { %2120 = vmatpush.bf16.msra.mxu3 %v2997_v22 }
 0x204   :  { %2083 = vmatpush.bf16.msra.mxu0 %v2581_v54  ;;  %2096 = vmatpush.bf16.msra.mxu1 %v2709_v55 }
 0x206   :  { %2108 = vmatpush.bf16.msra.mxu2 %v2853_v0  ;;  %v1277_v0 = vperm.slane %v1272_v31, 3 }
 0x207   :  { %2121 = vmatpush.bf16.msra.mxu3 %v2981_v1 }
 0x208   :  { %2084 = vmatpush.bf16.msra.mxu0 %v2565_v3  ;;  %2097 = vmatpush.bf16.msra.mxu1 %v2693_v4 }
 0x20a   :  { %2109 = vmatpush.bf16.msra.mxu2 %v2837_v13 }
 0x20b   :  { %2122 = vmatpush.bf16.msra.mxu3 %v2965_v14 }
 0x20c   :  { %2085 = vmatpush.bf16.msra.mxu0 %v2549_v18  ;;  %2098 = vmatpush.bf16.msra.mxu1 %v2677_v20 }
 0x20e   :  { %2110 = vmatpush.bf16.msra.mxu2 %v2821_v24 }
 0x20f   :  { %2123 = vmatpush.bf16.msra.mxu3 %v2949_v25  ;;  %2086 = vmatmul.bf16.vlgmr.msra.gmra.mxu0 %v3627_v15 }
 0x210   :  { %2099 = vmatmul.bf16.vlgmr.msra.gmra.mxu1 %v3630_v21 }
 0x212   :  { %2111 = vmatpush.bf16.msra.mxu2 %v2805_v27 }
 0x213   :  { %2124 = vmatpush.bf16.msra.mxu3 %v2933_v30 }
 0x215   :  { %2112 = vmatmul.bf16.vlgmr.msra.gmra.mxu2 %v3634_v32 }
 0x216   :  { %2125 = vmatmul.bf16.vlgmr.msra.gmra.mxu3 %v3636_v58 }
 0x24b   :  { %v1931_v34 = vpop.f32.mrf.mxu0 }
 0x24c   :  { %v1932_v35 = vadd.f32 %v1931_v34, %v1274_v33  ;;  %v1944_v36 = vpop.f32.mrf.mxu1 }
 0x24e   :  { %v1945_v59 = vadd.f32 %v1944_v36, %v1932_v35 }
 0x253   :  { %v1933_v19 = vpop.f32.mrf.mxu0 }
 0x254   :  { %v1946_v15 = vpop.f32.mrf.mxu1 }
 0x258   :  { %v1957_v41 = vpop.f32.mrf.mxu2 }
 0x259   :  { %v1958_v42 = vadd.f32 %v1957_v41, %v1945_v59  ;;  %v1970_v21 = vpop.f32.mrf.mxu3 }
 0x25b   :  { %v1971_v29 = vadd.f32 %v1970_v21, %v1958_v42  ;;  %v1983_v43 = vpop.f32.mrf.mxu0 }
 0x25c   :  { %v1996_v44 = vpop.f32.mrf.mxu1  ;;  %v1984_v62 = vadd.f32 %v1983_v43, %v1275_v56 }
 0x25e   :  { %v1997_v1 = vadd.f32 %v1996_v44, %v1984_v62 }
 0x260   :  { %v1959_v32 = vpop.f32.mrf.mxu2 }
 0x261   :  { %v1972_v45 = vpop.f32.mrf.mxu3 }
 0x263   :  { %v1985_v58 = vpop.f32.mrf.mxu0 }
 0x264   :  { %v1998_v46 = vpop.f32.mrf.mxu1 }
 0x268   :  { %v2009_v47 = vpop.f32.mrf.mxu2 }
 0x269   :  { %v2022_v60 = vpop.f32.mrf.mxu3  ;;  %v2010_v40 = vadd.f32 %v2009_v47, %v1997_v1 }
 0x26b   :  { %v2023_v8 = vadd.f32 %v2022_v60, %v2010_v40 }
 0x26c   :  { %v2035_v48 = vpop.f32.mrf.mxu0 }
 0x26d   :  { %v2036_v37 = vadd.f32 %v2035_v48, %v1276_v57  ;;  %v2134_v16 = vrot.slane %v2023_v8, 6 }
 0x26e   :  { %v2048_v23 = vpop.f32.mrf.mxu1 }
 0x26f   :  { %v2049_v2 = vadd.f32 %v2048_v23, %v2036_v37  ;;  %v2137_v38 = vsel %vm114_vm0, %v1971_v29, %v2134_v16 }
 0x270   :  { %v2011_v49 = vpop.f32.mrf.mxu2 }
 0x271   :  { %v2024_v50 = vpop.f32.mrf.mxu3 }
 0x274   :  { %v2037_v51 = vpop.f32.mrf.mxu0 }
 0x276   :  { %v2050_v22 = vpop.f32.mrf.mxu1 }
 0x278   :  { %v2061_v52 = vpop.f32.mrf.mxu2 }
 0x279   :  { %v2074_v53 = vpop.f32.mrf.mxu3  ;;  %v2062_v5 = vadd.f32 %v2061_v52, %v2049_v2 }
 0x27b   :  { %v2075_v12 = vadd.f32 %v2074_v53, %v2062_v5 }
 0x27d   :  { %v2135_v18 = vrot.slane %v2075_v12, 4 }
 0x280   :  { %v2063_v54 = vpop.f32.mrf.mxu2 }
 0x281   :  { %v2076_v55 = vpop.f32.mrf.mxu3 }
 0x28c   :  { %v2087_v61 = vpop.f32.mrf.mxu0 }
 0x28d   :  { %v2100_v63 = vpop.f32.mrf.mxu1  ;;  %v2088_v3 = vadd.f32 %v2087_v61, %v1277_v0 }
 0x28f   :  { %v2101_v9 = vadd.f32 %v2100_v63, %v2088_v3 }
 0x294   :  { %v2089_v4 = vpop.f32.mrf.mxu0 }
 0x295   :  { %v2102_v6 = vpop.f32.mrf.mxu1 }
 0x298   :  { %v2113_v11 = vpop.f32.mrf.mxu2 }
 0x299   :  { %v2114_v13 = vadd.f32 %v2113_v11, %v2101_v9  ;;  %v2126_v14 = vpop.f32.mrf.mxu3 }
 0x29b   :  { %v2127_v17 = vadd.f32 %v2126_v14, %v2114_v13 }
 0x29d   :  { %v2136_v20 = vrot.slane %v2127_v17, 2 }
 0x29f   :  { %v2139_v39 = vsel %vm2138_vm7, %v2135_v18, %v2136_v20 }
 0x2a0   :  { %v2141_v24 = vsel %vm2140_vm8, %v2137_v38, %v2139_v39  ;;  %v2115_v25 = vpop.f32.mrf.mxu2 }
 0x2a1   :  { %2143 = vst [vmem:[%s3672_s13] sm:$0xff] %v2141_v24  ;;  %v2128_v7 = vpop.f32.mrf.mxu3 }
 0x2a2   :  { %2148 = vsyncpa [#allocation5], 1 }
 0x2a3   :  { %2149 = vsyncpa [#allocation7], 1 }

</bundles_post_ra>
